<compile_context>
chip_gen: v7x
topology: tpu7x:2x2x1
jax: 0.10.0
libtpu: 0.0.40
codegen_flags: <defaults>
</compile_context>

<pallas_src>
import jax
import jax.numpy as jnp
from jax.experimental import pallas as pl
from jax.experimental.pallas import tpu as pltpu

# ----------------------------- model dimensions -----------------------------
N_ROWS   = 256    # number of cells / samples
N_INPUT  = 32
N_HIDDEN = 32
N_OUTPUT = 16
N_BATCH  = 2      # number of experimental batches (> 1 -> covariate injection)
VAR_EPS  = 1e-4

K0 = N_INPUT + N_BATCH + 1    # augmented layer-1 input width  ([x, onehot, 1])
H0 = N_HIDDEN + N_BATCH + 1   # augmented hidden width         ([h0, onehot, 1])


# ------------------------------- Pallas kernel ------------------------------
def variational_encoder_kernel(x_ref, noise_ref, w0_ref, wh_ref, out_ref):
    # Layer 1 (+ covariate + bias folded into K, carry columns for onehot / ones).
    h = jnp.maximum(
        jnp.dot(x_ref[...], w0_ref[...], preferred_element_type=jnp.float32), 0.0)
    # TODO(synk): train-mode Dropout(p=0.1) not implemented (eval-mode identity).

    # Layer 2 fused into the mean/var heads: one (H0, 2*n_output) matmul, covariate
    # rows and all biases already baked into wh via the carried onehot / ones columns.
    mv = jnp.dot(h, wh_ref[...], preferred_element_type=jnp.float32)

    q_m = mv[:, :N_OUTPUT]
    q_v = jnp.exp(mv[:, N_OUTPUT:]) + VAR_EPS
    z = q_m + jnp.sqrt(q_v) * noise_ref[...]

    # Lane-dense fused output (q_m | q_v | z): one wide store instead of three masked.
    out_ref[...] = jnp.concatenate([q_m, q_v, z], axis=-1)


# --------------------------- wrapper-side param prep -------------------------
def build_fused_params(params):
    """Fold covariates + biases into the K dimension and layer 2 into the heads."""
    f32 = jnp.float32

    # --- layer 1: (K0, H0) ---
    w0 = jnp.zeros((K0, H0), f32)
    w0 = w0.at[:N_INPUT, :N_HIDDEN].set(params["w0x"])                 # x part
    w0 = w0.at[N_INPUT:N_INPUT + N_BATCH, :N_HIDDEN].set(params["w0b"])  # onehot part
    w0 = w0.at[N_INPUT + N_BATCH, :N_HIDDEN].set(params["b0"][0])      # bias row
    # Identity "carry" columns: pass onehot(b) and the constant 1 through the ReLU
    # (both are in {0,1}, so ReLU is the identity on them).
    w0 = w0.at[N_INPUT:, N_HIDDEN:].set(jnp.eye(N_BATCH + 1, dtype=f32))

    # --- layer 2 fused into heads: (H0, 2*n_output) ---
    heads_w = jnp.concatenate([params["wm"], params["wv"]], axis=1)    # (H, 2*out)
    heads_b = jnp.concatenate([params["bm"], params["bv"]], axis=1)    # (1, 2*out)
    wh = jnp.zeros((H0, 2 * N_OUTPUT), f32)
    wh = wh.at[:N_HIDDEN].set(params["w1h"] @ heads_w)                 # h0 part
    wh = wh.at[N_HIDDEN:N_HIDDEN + N_BATCH].set(params["w1b"] @ heads_w)  # onehot part
    wh = wh.at[N_HIDDEN + N_BATCH].set((params["b1"] @ heads_w + heads_b)[0])  # bias
    return w0, wh


def _row_block(n_rows):
    """grid=1 on single-TC parts (v5e/v6e); even 'parallel' grid on dual-TC parts."""
    try:
        kind = jax.devices()[0].device_kind.lower()
    except Exception:
        kind = ""
    dual_tc = ("v7" in kind) or ("v4" in kind) or ("v5p" in kind)
    half = n_rows // 2
    if dual_tc and n_rows % 2 == 0 and half % 8 == 0:
        return half
    return n_rows


# --------------------------------- wrapper -----------------------------------
def variational_encoder(x, batch_index, params, noise):
    """x: (N, n_input) f32; batch_index: (N,) int32; noise: (N, n_output) f32."""
    n_rows = x.shape[0]
    row_block = _row_block(n_rows)
    assert n_rows % row_block == 0

    # Augmented input: [x, onehot(batch), 1]  -> covariate + bias live in MXU's K dim.
    oh = jax.nn.one_hot(batch_index, N_BATCH, dtype=jnp.float32)
    ones = jnp.ones((n_rows, 1), jnp.float32)
    x_aug = jnp.concatenate([x, oh, ones], axis=1)                     # (N, K0)

    w0, wh = build_fused_params(params)

    def rows(cols):        # row-tiled activations / outputs
        return pl.BlockSpec((row_block, cols), lambda i: (i, 0))

    def resident(shape):   # weights: DMA'd once, stay resident in VMEM across the grid
        return pl.BlockSpec(shape, lambda i: (0, 0))

    fused = pl.pallas_call(
        variational_encoder_kernel,
        out_shape=jax.ShapeDtypeStruct((n_rows, 3 * N_OUTPUT), jnp.float32),
        grid_spec=pltpu.PrefetchScalarGridSpec(
            num_scalar_prefetch=0,
            grid=(n_rows // row_block,),
            in_specs=[
                rows(K0),                            # x_aug = [x, onehot, 1]
                rows(N_OUTPUT),                      # reparameterization noise
                resident((K0, H0)),                  # fused layer-1 weights
                resident((H0, 2 * N_OUTPUT)),        # fused layer-2 + head weights
            ],
            out_specs=rows(3 * N_OUTPUT),
        ),
        compiler_params=pltpu.CompilerParams(
            dimension_semantics=("parallel",),       # shards rows across dual-TC parts
        ),
    )(x_aug, noise, w0, wh)

    q_m = fused[:, :N_OUTPUT]
    q_v = fused[:, N_OUTPUT:2 * N_OUTPUT]
    z = fused[:, 2 * N_OUTPUT:]
    return q_m, q_v, z


# --------------------------- deterministic params -----------------------------
def init_params(key):
    ks = jax.random.split(key, 8)
    s = 0.1
    return {
        # Layer 1: Linear(n_input + n_batch -> n_hidden), split into x-part / onehot-part
        "w0x": s * jax.random.normal(ks[0], (N_INPUT, N_HIDDEN), jnp.float32),
        "w0b": s * jax.random.normal(ks[1], (N_BATCH, N_HIDDEN), jnp.float32),
        "b0":  jnp.zeros((1, N_HIDDEN), jnp.float32),
        # Layer 2: Linear(n_hidden + n_batch -> n_hidden)
        "w1h": s * jax.random.normal(ks[2], (N_HIDDEN, N_HIDDEN), jnp.float32),
        "w1b": s * jax.random.normal(ks[3], (N_BATCH, N_HIDDEN), jnp.float32),
        "b1":  jnp.zeros((1, N_HIDDEN), jnp.float32),
        # mean / var heads: Linear(n_hidden -> n_output)
        "wm":  s * jax.random.normal(ks[4], (N_HIDDEN, N_OUTPUT), jnp.float32),
        "bm":  jnp.zeros((1, N_OUTPUT), jnp.float32),
        "wv":  s * jax.random.normal(ks[5], (N_HIDDEN, N_OUTPUT), jnp.float32),
        "bv":  jnp.zeros((1, N_OUTPUT), jnp.float32),
    }


def reference_forward(x, batch_index, params, noise):
    """Pure-JAX reference of the original (unfused) forward pass."""
    oh = jax.nn.one_hot(batch_index, N_BATCH, dtype=jnp.float32)
    h = jnp.maximum(x @ params["w0x"] + oh @ params["w0b"] + params["b0"], 0.0)
    h = h @ params["w1h"] + oh @ params["w1b"] + params["b1"]
    q_m = h @ params["wm"] + params["bm"]
    q_v = jnp.exp(h @ params["wv"] + params["bv"]) + VAR_EPS
    z = q_m + jnp.sqrt(q_v) * noise
    return q_m, q_v, z


if __name__ == "__main__":
    key = jax.random.PRNGKey(0)
    k_x, k_p, k_b, k_n = jax.random.split(key, 4)

    x = jax.random.normal(k_x, (N_ROWS, N_INPUT), jnp.float32)
    batch_index = jax.random.randint(k_b, (N_ROWS,), 0, N_BATCH, jnp.int32)
    params = init_params(k_p)
    # TODO(synk): noise could be generated in-kernel via pltpu.prng_seed +
    # pltpu.stateful_normal; kept as an input so the pure-JAX reference matches exactly.
    noise = jax.random.normal(k_n, (N_ROWS, N_OUTPUT), jnp.float32)

    q_m, q_v, latent = variational_encoder(x, batch_index, params, noise)
    jax.block_until_ready((q_m, q_v, latent))

    rm, rv, rz = reference_forward(x, batch_index, params, noise)
    assert jnp.allclose(q_m, rm, atol=1e-5, rtol=1e-5)
    assert jnp.allclose(q_v, rv, atol=1e-5, rtol=1e-5)
    assert jnp.allclose(latent, rz, atol=1e-5, rtol=1e-5)

    print("KERNEL_OK")
</pallas_src>

<mosaic_0001>
module attributes {stable_mosaic.version = 11 : i64} {
  func.func @variational_encoder_kernel(%arg0: i32, %arg1: memref<256x35xf32, #tpu.memory_space<vmem>>, %arg2: memref<256x16xf32, #tpu.memory_space<vmem>>, %arg3: memref<35x35xf32, #tpu.memory_space<vmem>>, %arg4: memref<35x32xf32, #tpu.memory_space<vmem>>, %arg5: memref<256x48xf32, #tpu.memory_space<vmem>>) attributes {dimension_semantics = [#tpu.dimension_semantics<parallel>], iteration_bounds = array<i64: 1>, scalar_prefetch = 0 : i64, scratch_operands = 0 : i64, tpu.core_type = #tpu.core_type<tc>, window_params = [{transform_indices = @transform_0, window_bounds = array<i64: 256, 35>}, {transform_indices = @transform_1, window_bounds = array<i64: 256, 16>}, {pipeline_mode = #tpu.pipeline_mode<synchronous>, transform_indices = @transform_2, window_bounds = array<i64: 35, 35>}, {pipeline_mode = #tpu.pipeline_mode<synchronous>, transform_indices = @transform_3, window_bounds = array<i64: 35, 32>}, {transform_indices = @transform_4, window_bounds = array<i64: 256, 48>}]} {
    %c0 = arith.constant 0 : index
    %c0_0 = arith.constant 0 : index
    %0 = vector.load %arg1[%c0, %c0_0] : memref<256x35xf32, #tpu.memory_space<vmem>>, vector<256x35xf32>
    %c0_1 = arith.constant 0 : index
    %c0_2 = arith.constant 0 : index
    %1 = vector.load %arg3[%c0_1, %c0_2] : memref<35x35xf32, #tpu.memory_space<vmem>>, vector<35x35xf32>
    %cst = arith.constant dense<0.000000e+00> : vector<256x35xf32>
    %2 = tpu.matmul %0, %1, %cst {dimension_numbers = #tpu.dot_dimension_numbers<[1], [0], [0], [1], [0, 0, 1, 1], [], []>} : vector<256x35xf32>, vector<35x35xf32>, vector<256x35xf32> -> vector<256x35xf32>
    %cst_3 = arith.constant 0.000000e+00 : f32
    %3 = vector.broadcast %cst_3 : f32 to vector<256x35xf32>
    %4 = arith.maximumf %2, %3 : vector<256x35xf32>
    %c0_4 = arith.constant 0 : index
    %c0_5 = arith.constant 0 : index
    %5 = vector.load %arg4[%c0_4, %c0_5] : memref<35x32xf32, #tpu.memory_space<vmem>>, vector<35x32xf32>
    %cst_6 = arith.constant dense<0.000000e+00> : vector<256x32xf32>
    %6 = tpu.matmul %4, %5, %cst_6 {dimension_numbers = #tpu.dot_dimension_numbers<[1], [0], [0], [1], [0, 0, 1, 1], [], []>} : vector<256x35xf32>, vector<35x32xf32>, vector<256x32xf32> -> vector<256x32xf32>
    %7 = vector.extract_strided_slice %6 {offsets = [0, 0], sizes = [256, 16], strides = [1, 1]} : vector<256x32xf32> to vector<256x16xf32>
    %8 = vector.extract_strided_slice %6 {offsets = [0, 16], sizes = [256, 16], strides = [1, 1]} : vector<256x32xf32> to vector<256x16xf32>
    %9 = math.exp %8 : vector<256x16xf32>
    %cst_7 = arith.constant 9.99999974E-5 : f32
    %10 = vector.broadcast %cst_7 : f32 to vector<256x16xf32>
    %11 = arith.addf %9, %10 : vector<256x16xf32>
    %12 = math.sqrt %11 : vector<256x16xf32>
    %c0_8 = arith.constant 0 : index
    %c0_9 = arith.constant 0 : index
    %13 = vector.load %arg2[%c0_8, %c0_9] : memref<256x16xf32, #tpu.memory_space<vmem>>, vector<256x16xf32>
    %14 = arith.mulf %12, %13 : vector<256x16xf32>
    %15 = arith.addf %7, %14 : vector<256x16xf32>
    %16 = tpu.concatenate %7, %11, %15 in 1 : vector<256x16xf32>, vector<256x16xf32>, vector<256x16xf32> -> vector<256x48xf32>
    %c0_10 = arith.constant 0 : index
    %c0_11 = arith.constant 0 : index
    %17 = vector.load %arg5[%c0_10, %c0_11] : memref<256x48xf32, #tpu.memory_space<vmem>>, vector<256x48xf32>
    tpu.vector_store %arg5[%c0_10, %c0_11], %16 {strides = array<i32>} : memref<256x48xf32, #tpu.memory_space<vmem>>, vector<256x48xf32>,
    return
  }
  func.func @transform_0(%arg0: i32) -> (i32, i32) {
    %c0_i32 = arith.constant 0 : i32
    %c0_i32_0 = arith.constant 0 : i32
    return %arg0, %c0_i32 : i32, i32
  }
  func.func @transform_1(%arg0: i32) -> (i32, i32) {
    %c0_i32 = arith.constant 0 : i32
    %c0_i32_0 = arith.constant 0 : i32
    return %arg0, %c0_i32 : i32, i32
  }
  func.func @transform_2(%arg0: i32) -> (i32, i32) {
    %c0_i32 = arith.constant 0 : i32
    %c0_i32_0 = arith.constant 0 : i32
    %c0_i32_1 = arith.constant 0 : i32
    return %c0_i32, %c0_i32_0 : i32, i32
  }
  func.func @transform_3(%arg0: i32) -> (i32, i32) {
    %c0_i32 = arith.constant 0 : i32
    %c0_i32_0 = arith.constant 0 : i32
    %c0_i32_1 = arith.constant 0 : i32
    return %c0_i32, %c0_i32_0 : i32, i32
  }
  func.func @transform_4(%arg0: i32) -> (i32, i32) {
    %c0_i32 = arith.constant 0 : i32
    %c0_i32_0 = arith.constant 0 : i32
    return %arg0, %c0_i32 : i32, i32
  }
}

</mosaic_0001>

<bundles_post_ra>
// kernel: tpu_custom_call.1
= control target key start
LH: loop header
LB: loop body
LE: loop exit
PB: predicated region body
PF: predicated region fallthrough
CT: control target
= control target key end

     0   :  { %vm54_vm0 = vcmask 285696   ;;  %vm151_vm1 = vcmask 1042432   ;;  %s2047_s22 = smov 16   ;;  %vm1541_vm2 = vcmask 130048   ;;  %s3341_s2 = inlined_call_operand.vmem [shape: f32[35,35], index: 2, kind: input, shape index: {}]   ;;  %s3342_s0 = inlined_call_operand.vmem [shape: f32[256,35], index: 0, kind: input, shape index: {}]   ;;  %s3343_s3 = inlined_call_operand.vmem [shape: f32[35,32], index: 3, kind: input, shape index: {}]   ;;  %s3344_s1 = inlined_call_operand.vmem [shape: f32[256,16], index: 1, kind: input, shape index: {}]   ;;  %s3345_s4 = inlined_call_operand.vmem [shape: f32[256,48], index: 4, kind: output, shape index: {}]  }
   0x1   :  { %v49_v0 = vld [vmem:[%s3341_s2] sm:$0xff]  ;;  %v50_v1 = vld [vmem:[%s3341_s2 + $0x8] sm:$0xff]  ;;  %v51_v2 = vld [vmem:[%s3341_s2 + $0x10] sm:$0xff] }
   0x2   :  { %v1900_v3 = vpack.c.bf16 %v50_v1, %v49_v0  ;;  %v52_v4 = vld [vmem:[%s3341_s2 + $0x18] sm:$0xff]  ;;  %v17_v5 = vld [vmem:[%s3342_s0] sm:$0xff]  ;;  %v18_v8 = vld [vmem:[%s3342_s0 + $0x8] sm:$0xff] }
   0x3   :  { %v1904_v6 = vpack.c.bf16 %v52_v4, %v51_v2  ;;  %1794 = vmatprep.mubr.msk.f32.mxu0 %vm54_vm0, %v17_v5  ;;  %v53_v7 = vld [vmem:[%s3341_s2 + $0x20] sm:$0x7]  ;;  %v19_v9 = vld [vmem:[%s3342_s0 + $0x10] sm:$0xff]  ;;  %v413_v11 = vld [vmem:[%s3343_s3 + $0x8] sm:$0xff] }
   0x4   :  { %1901 = vmatprep.subr.bf16.mxu0 %v1900_v3  ;;  %v412_v10 = vld [vmem:[%s3343_s3] sm:$0xff]  ;;  %v414_v13 = vld [vmem:[%s3343_s3 + $0x10] sm:$0xff]  ;;  %v415_v14 = vld [vmem:[%s3343_s3 + $0x18] sm:$0xff] }
   0x5   :  { %1903 = vmatpush3.bf16.msra.mxu0 %v1900_v3  ;;  %v1908_v12 = vpack.c.bf16 %v413_v11, %v412_v10  ;;  %v20_v15 = vld [vmem:[%s3342_s0 + $0x18] sm:$0xff]  ;;  %v1912_v16 = vpack.c.bf16 %v415_v14, %v414_v13  ;;  %v21_v17 = vld [vmem:[%s3342_s0 + $0x20] sm:$0xff]  ;;  %v22_v18 = vld [vmem:[%s3342_s0 + $0x28] sm:$0xff] }
   0x6   :  { %1905 = vmatprep.subr.bf16.mxu0 %v1904_v6  ;;  %v23_v19 = vld [vmem:[%s3342_s0 + $0x30] sm:$0xff]  ;;  %v24_v20 = vld [vmem:[%s3342_s0 + $0x38] sm:$0xff]  ;;  %v25_v21 = vld [vmem:[%s3342_s0 + $0x40] sm:$0xff] }
   0x7   :  { %1909 = vmatprep.subr.bf16.mxu1 %v1908_v12  ;;  %v26_v22 = vld [vmem:[%s3342_s0 + $0x48] sm:$0xff]  ;;  %v27_v23 = vld [vmem:[%s3342_s0 + $0x50] sm:$0xff]  ;;  %v28_v24 = vld [vmem:[%s3342_s0 + $0x58] sm:$0xff] }
   0x8   :  { %1911 = vmatpush3.bf16.msra.mxu1 %v1908_v12  ;;  %v29_v25 = vld [vmem:[%s3342_s0 + $0x60] sm:$0xff]  ;;  %v30_v26 = vld [vmem:[%s3342_s0 + $0x68] sm:$0xff]  ;;  %v31_v27 = vld [vmem:[%s3342_s0 + $0x70] sm:$0xff] }
   0x9   :  { %1907 = vmatpush3.bf16.msra.mxu0 %v1904_v6  ;;  %1913 = vmatprep.subr.bf16.mxu1 %v1912_v16  ;;  %v32_v28 = vld [vmem:[%s3342_s0 + $0x78] sm:$0xff]  ;;  %v33_v29 = vld [vmem:[%s3342_s0 + $0x80] sm:$0xff]  ;;  %v34_v30 = vld [vmem:[%s3342_s0 + $0x88] sm:$0xff] }
   0xa   :  { %1792 = vmatprep.subr.msk.mxu0 %vm151_vm1, %v53_v7  ;;  %v35_v31 = vld [vmem:[%s3342_s0 + $0x90] sm:$0xff]  ;;  %v36_v32 = vld [vmem:[%s3342_s0 + $0x98] sm:$0xff]  ;;  %v37_v33 = vld [vmem:[%s3342_s0 + $0xa0] sm:$0xff] }
   0xb   :  { %v38_v34 = vld [vmem:[%s3342_s0 + $0xa8] sm:$0xff]  ;;  %v39_v35 = vld [vmem:[%s3342_s0 + $0xb0] sm:$0xff]  ;;  %v40_v36 = vld [vmem:[%s3342_s0 + $0xb8] sm:$0xff] }
   0xc   :  { %1915 = vmatpush3.bf16.msra.mxu1 %v1912_v16  ;;  %v41_v37 = vld [vmem:[%s3342_s0 + $0xc0] sm:$0xff]  ;;  %v42_v38 = vld [vmem:[%s3342_s0 + $0xc8] sm:$0xff]  ;;  %v43_v39 = vld [vmem:[%s3342_s0 + $0xd0] sm:$0xff] }
   0xd   :  { %1793 = vmatpush3.msk.msra.mxu0 %vm151_vm1, %v53_v7  ;;  %v44_v40 = vld [vmem:[%s3342_s0 + $0xd8] sm:$0xff]  ;;  %v45_v41 = vld [vmem:[%s3342_s0 + $0xe0] sm:$0xff]  ;;  %v46_v42 = vld [vmem:[%s3342_s0 + $0xe8] sm:$0xff] }
   0xe   :  { %1795 = vmatmul.mubr.msk.f32.vlgmr.msra.gmra.mrb[0].mxu0 %vm54_vm0, %v18_v8  ;;  %v47_v43 = vld [vmem:[%s3342_s0 + $0xf0] sm:$0xff]  ;;  %v48_v44 = vld [vmem:[%s3342_s0 + $0xf8] sm:$0xff]  ;;  %v416_v45 = vld [vmem:[%s3343_s3 + $0x20] sm:$0x7] }
   0xf   :  { %1797 = vmatprep.mubr.msk.f32.mxu0 %vm54_vm0, %v19_v9  ;;  %1850 = vmatprep.subr.msk.mxu1 %vm151_vm1, %v416_v45  ;;  %v1061_v46 = vld [vmem:[%s3344_s1] sm:$0xff]  ;;  %v1063_v47 = vld [vmem:[%s3344_s1 + $0x10] sm:$0xff]  ;;  %v1062_v48 = vld [vmem:[%s3344_s1 + $0x8] sm:$0xff] }
  0x10   :  { %1851 = vmatpush3.msk.msra.mxu1 %vm151_vm1, %v416_v45  ;;  %1125 = vrot.lane.b32.xlu0 %v1061_v46, %s2047_s22  ;;  %v1064_v49 = vld [vmem:[%s3344_s1 + $0x18] sm:$0xff]  ;;  %v1066_v50 = vld [vmem:[%s3344_s1 + $0x28] sm:$0xff]  ;;  %v1065_v51 = vld [vmem:[%s3344_s1 + $0x20] sm:$0xff] }
  0x11   :  { %1129 = vrot.lane.b32.xlu1 %v1063_v47, %s2047_s22  ;;  %v1068_v52 = vld [vmem:[%s3344_s1 + $0x38] sm:$0xff]  ;;  %v1067_v53 = vld [vmem:[%s3344_s1 + $0x30] sm:$0xff]  ;;  %v1070_v54 = vld [vmem:[%s3344_s1 + $0x48] sm:$0xff] }
  0x12   :  { %1798 = vmatmul.mubr.msk.f32.gmra.mrb[2].mxu0 %vm54_vm0, %v20_v15  ;;  %v1069_v55 = vld [vmem:[%s3344_s1 + $0x40] sm:$0xff]  ;;  %v1072_v56 = vld [vmem:[%s3344_s1 + $0x58] sm:$0xff]  ;;  %v1071_v57 = vld [vmem:[%s3344_s1 + $0x50] sm:$0xff] }
  0x13   :  { %1800 = vmatprep.mubr.msk.f32.mxu0 %vm54_vm0, %v21_v17  ;;  %v1074_v58 = vld [vmem:[%s3344_s1 + $0x68] sm:$0xff]  ;;  %v1073_v59 = vld [vmem:[%s3344_s1 + $0x60] sm:$0xff]  ;;  %v1076_v60 = vld [vmem:[%s3344_s1 + $0x78] sm:$0xff] }
  0x14   :  { %1127 = vrot.lane.b32.xlu0 %v1062_v48, %s2047_s22  ;;  %v1075_v61 = vld [vmem:[%s3344_s1 + $0x70] sm:$0xff]  ;;  %v1078_v62 = vld [vmem:[%s3344_s1 + $0x88] sm:$0xff]  ;;  %v1077_v63 = vld [vmem:[%s3344_s1 + $0x80] sm:$0xff] }
  0x15   :  { %1131 = vrot.lane.b32.xlu1 %v1064_v49, %s2047_s22  ;;  %v1080_v0 = vld [vmem:[%s3344_s1 + $0x98] sm:$0xff]  ;;  %v1079_v1 = vld [vmem:[%s3344_s1 + $0x90] sm:$0xff]  ;;  %v1082_v2 = vld [vmem:[%s3344_s1 + $0xa8] sm:$0xff] }
  0x16   :  { %1801 = vmatmul.mubr.msk.f32.gmra.mrb[4].mxu0 %vm54_vm0, %v22_v18  ;;  %v1081_v3 = vld [vmem:[%s3344_s1 + $0xa0] sm:$0xff]  ;;  %v1084_v4 = vld [vmem:[%s3344_s1 + $0xb8] sm:$0xff]  ;;  %v1083_v5 = vld [vmem:[%s3344_s1 + $0xb0] sm:$0xff] }
  0x17   :  { %1803 = vmatprep.mubr.msk.f32.mxu0 %vm54_vm0, %v23_v19  ;;  %v1086_v6 = vld [vmem:[%s3344_s1 + $0xc8] sm:$0xff]  ;;  %v1085_v7 = vld [vmem:[%s3344_s1 + $0xc0] sm:$0xff]  ;;  %v1088_v8 = vld [vmem:[%s3344_s1 + $0xd8] sm:$0xff] }
  0x18   :  { %1133 = vrot.lane.b32.xlu0 %v1065_v51, %s2047_s22  ;;  %v1087_v9 = vld [vmem:[%s3344_s1 + $0xd0] sm:$0xff]  ;;  %v1090_v10 = vld [vmem:[%s3344_s1 + $0xe8] sm:$0xff]  ;;  %v1089_v11 = vld [vmem:[%s3344_s1 + $0xe0] sm:$0xff] }
  0x19   :  { %1135 = vrot.lane.b32.xlu1 %v1066_v50, %s2047_s22  ;;  %v1092_v12 = vld [vmem:[%s3344_s1 + $0xf8] sm:$0xff]  ;;  %v1091_v13 = vld [vmem:[%s3344_s1 + $0xf0] sm:$0xff]  ;;  %s2048_s1 = smov 112  }
  0x1a   :  { %1804 = vmatmul.mubr.msk.f32.gmra.mrb[6].mxu0 %vm54_vm0, %v24_v20 }
  0x1b   :  { %1806 = vmatprep.mubr.msk.f32.mxu0 %vm54_vm0, %v25_v21 }
  0x1c   :  { %1137 = vrot.lane.b32.xlu0 %v1067_v53, %s2047_s22 }
  0x1d   :  { %1139 = vrot.lane.b32.xlu1 %v1068_v52, %s2047_s22 }
  0x1e   :  { %1807 = vmatmul.mubr.msk.f32.gmra.mrb[8].mxu0 %vm54_vm0, %v26_v22 }
  0x1f   :  { %1809 = vmatprep.mubr.msk.f32.mxu0 %vm54_vm0, %v27_v23 }
  0x20   :  { %1141 = vrot.lane.b32.xlu0 %v1069_v55, %s2047_s22 }
  0x21   :  { %1143 = vrot.lane.b32.xlu1 %v1070_v54, %s2047_s22 }
  0x22   :  { %1810 = vmatmul.mubr.msk.f32.gmra.mrb[10].mxu0 %vm54_vm0, %v28_v24 }
  0x23   :  { %1812 = vmatprep.mubr.msk.f32.mxu0 %vm54_vm0, %v29_v25 }
  0x24   :  { %1145 = vrot.lane.b32.xlu0 %v1071_v57, %s2047_s22 }
  0x25   :  { %1147 = vrot.lane.b32.xlu1 %v1072_v56, %s2047_s22 }
  0x26   :  { %1813 = vmatmul.mubr.msk.f32.gmra.mrb[12].mxu0 %vm54_vm0, %v30_v26 }
  0x27   :  { %1815 = vmatprep.mubr.msk.f32.mxu0 %vm54_vm0, %v31_v27 }
  0x28   :  { %1149 = vrot.lane.b32.xlu0 %v1073_v59, %s2047_s22 }
  0x29   :  { %1151 = vrot.lane.b32.xlu1 %v1074_v58, %s2047_s22 }
  0x2a   :  { %1816 = vmatmul.mubr.msk.f32.gmra.mrb[14].mxu0 %vm54_vm0, %v32_v28 }
  0x2b   :  { %1818 = vmatprep.mubr.msk.f32.mxu0 %vm54_vm0, %v33_v29 }
  0x2c   :  { %1153 = vrot.lane.b32.xlu0 %v1075_v61, %s2047_s22 }
  0x2d   :  { %1155 = vrot.lane.b32.xlu1 %v1076_v60, %s2047_s22 }
  0x2e   :  { %1819 = vmatmul.mubr.msk.f32.gmra.mrb[16].mxu0 %vm54_vm0, %v34_v30 }
  0x2f   :  { %1821 = vmatprep.mubr.msk.f32.mxu0 %vm54_vm0, %v35_v31 }
  0x30   :  { %1157 = vrot.lane.b32.xlu0 %v1077_v63, %s2047_s22 }
  0x31   :  { %1159 = vrot.lane.b32.xlu1 %v1078_v62, %s2047_s22 }
  0x32   :  { %1822 = vmatmul.mubr.msk.f32.gmra.mrb[18].mxu0 %vm54_vm0, %v36_v32 }
  0x33   :  { %1824 = vmatprep.mubr.msk.f32.mxu0 %vm54_vm0, %v37_v33 }
  0x34   :  { %1161 = vrot.lane.b32.xlu0 %v1079_v1, %s2047_s22 }
  0x35   :  { %1163 = vrot.lane.b32.xlu1 %v1080_v0, %s2047_s22 }
  0x36   :  { %1825 = vmatmul.mubr.msk.f32.gmra.mrb[20].mxu0 %vm54_vm0, %v38_v34 }
  0x37   :  { %1827 = vmatprep.mubr.msk.f32.mxu0 %vm54_vm0, %v39_v35 }
  0x38   :  { %1165 = vrot.lane.b32.xlu0 %v1081_v3, %s2047_s22 }
  0x39   :  { %1167 = vrot.lane.b32.xlu1 %v1082_v2, %s2047_s22 }
  0x3a   :  { %1828 = vmatmul.mubr.msk.f32.gmra.mrb[22].mxu0 %vm54_vm0, %v40_v36 }
  0x3b   :  { %1830 = vmatprep.mubr.msk.f32.mxu0 %vm54_vm0, %v41_v37 }
  0x3c   :  { %1169 = vrot.lane.b32.xlu0 %v1083_v5, %s2047_s22 }
  0x3d   :  { %1171 = vrot.lane.b32.xlu1 %v1084_v4, %s2047_s22 }
  0x3e   :  { %1831 = vmatmul.mubr.msk.f32.gmra.mrb[24].mxu0 %vm54_vm0, %v42_v38 }
  0x3f   :  { %1833 = vmatprep.mubr.msk.f32.mxu0 %vm54_vm0, %v43_v39 }
  0x40   :  { %1173 = vrot.lane.b32.xlu0 %v1085_v7, %s2047_s22 }
  0x41   :  { %1175 = vrot.lane.b32.xlu1 %v1086_v6, %s2047_s22 }
  0x42   :  { %1834 = vmatmul.mubr.msk.f32.gmra.mrb[26].mxu0 %vm54_vm0, %v44_v40 }
  0x43   :  { %1836 = vmatprep.mubr.msk.f32.mxu0 %vm54_vm0, %v45_v41 }
  0x44   :  { %1177 = vrot.lane.b32.xlu0 %v1087_v9, %s2047_s22 }
  0x45   :  { %1179 = vrot.lane.b32.xlu1 %v1088_v8, %s2047_s22 }
  0x46   :  { %1837 = vmatmul.mubr.msk.f32.gmra.mrb[28].mxu0 %vm54_vm0, %v46_v42 }
  0x47   :  { %1839 = vmatprep.mubr.msk.f32.mxu0 %vm54_vm0, %v47_v43 }
  0x48   :  { %1181 = vrot.lane.b32.xlu0 %v1089_v11, %s2047_s22 }
  0x49   :  { %1183 = vrot.lane.b32.xlu1 %v1090_v10, %s2047_s22 }
  0x4a   :  { %1840 = vmatmul.mubr.msk.f32.gmra.mrb[30].mxu0 %vm54_vm0, %v48_v44 }
  0x4c   :  { %1185 = vrot.lane.b32.xlu0 %v1091_v13, %s2047_s22 }
  0x4d   :  { %1187 = vrot.lane.b32.xlu1 %v1092_v12, %s2047_s22  ;;  %s2049_s22 = smov 32  }
  0xe1   :  { %v1796_v14 = vpop.f32.mrb[0].mxu0 }
  0xe2   :  { %v221_v15 = vpop.f32.mrb[1].mxu0  ;;  %v381_v17 = vmax.f32 %v1796_v14, 0.0 }
  0xe3   :  { %v380_v16 = vmax.f32 %v221_v15, 0.0 }
  0xe5   :  { %v1799_v18 = vpop.f32.mrb[2].mxu0  ;;  %1852 = vmatprep.mubr.msk.f32.mxu1 %vm54_vm0, %v380_v16 }
  0xe6   :  { %v231_v19 = vpop.f32.mrb[3].mxu0  ;;  %1853 = vmatmul.mubr.msk.f32.vlgmr.msra.gmra.mrb[0].mxu1 %vm54_vm0, %v381_v17  ;;  %v383_v21 = vmax.f32 %v1799_v18, 0.0 }
  0xe7   :  { %v382_v20 = vmax.f32 %v231_v19, 0.0 }
  0xe9   :  { %v1802_v22 = vpop.f32.mrb[4].mxu0  ;;  %1855 = vmatprep.mubr.msk.f32.mxu1 %vm54_vm0, %v382_v20 }
  0xea   :  { %v241_v23 = vpop.f32.mrb[5].mxu0  ;;  %1856 = vmatmul.mubr.msk.f32.gmra.mrb[2].mxu1 %vm54_vm0, %v383_v21  ;;  %v385_v25 = vmax.f32 %v1802_v22, 0.0 }
  0xeb   :  { %v384_v24 = vmax.f32 %v241_v23, 0.0 }
  0xed   :  { %v1805_v26 = vpop.f32.mrb[6].mxu0  ;;  %1858 = vmatprep.mubr.msk.f32.mxu1 %vm54_vm0, %v384_v24 }
  0xee   :  { %v251_v27 = vpop.f32.mrb[7].mxu0  ;;  %1859 = vmatmul.mubr.msk.f32.gmra.mrb[4].mxu1 %vm54_vm0, %v385_v25  ;;  %v387_v29 = vmax.f32 %v1805_v26, 0.0 }
  0xef   :  { %v386_v28 = vmax.f32 %v251_v27, 0.0 }
  0xf1   :  { %v1808_v30 = vpop.f32.mrb[8].mxu0  ;;  %1861 = vmatprep.mubr.msk.f32.mxu1 %vm54_vm0, %v386_v28 }
  0xf2   :  { %v261_v31 = vpop.f32.mrb[9].mxu0  ;;  %1862 = vmatmul.mubr.msk.f32.gmra.mrb[6].mxu1 %vm54_vm0, %v387_v29  ;;  %v389_v33 = vmax.f32 %v1808_v30, 0.0 }
  0xf3   :  { %v388_v32 = vmax.f32 %v261_v31, 0.0 }
  0xf5   :  { %v1811_v34 = vpop.f32.mrb[10].mxu0  ;;  %1864 = vmatprep.mubr.msk.f32.mxu1 %vm54_vm0, %v388_v32 }
  0xf6   :  { %v271_v35 = vpop.f32.mrb[11].mxu0  ;;  %1865 = vmatmul.mubr.msk.f32.gmra.mrb[8].mxu1 %vm54_vm0, %v389_v33  ;;  %v391_v37 = vmax.f32 %v1811_v34, 0.0 }
  0xf7   :  { %v390_v36 = vmax.f32 %v271_v35, 0.0 }
  0xf9   :  { %v1814_v38 = vpop.f32.mrb[12].mxu0  ;;  %1867 = vmatprep.mubr.msk.f32.mxu1 %vm54_vm0, %v390_v36 }
  0xfa   :  { %v281_v39 = vpop.f32.mrb[13].mxu0  ;;  %1868 = vmatmul.mubr.msk.f32.gmra.mrb[10].mxu1 %vm54_vm0, %v391_v37  ;;  %v393_v41 = vmax.f32 %v1814_v38, 0.0 }
  0xfb   :  { %v392_v40 = vmax.f32 %v281_v39, 0.0 }
  0xfd   :  { %v1817_v42 = vpop.f32.mrb[14].mxu0  ;;  %1870 = vmatprep.mubr.msk.f32.mxu1 %vm54_vm0, %v392_v40 }
  0xfe   :  { %v291_v43 = vpop.f32.mrb[15].mxu0  ;;  %1871 = vmatmul.mubr.msk.f32.gmra.mrb[12].mxu1 %vm54_vm0, %v393_v41  ;;  %v395_v45 = vmax.f32 %v1817_v42, 0.0 }
  0xff   :  { %v394_v44 = vmax.f32 %v291_v43, 0.0 }
 0x101   :  { %v1820_v46 = vpop.f32.mrb[16].mxu0  ;;  %1873 = vmatprep.mubr.msk.f32.mxu1 %vm54_vm0, %v394_v44  ;;  %v2446_v44 = vpop.permute.xlu1 %1129 }
 0x102   :  { %v301_v47 = vpop.f32.mrb[17].mxu0  ;;  %1874 = vmatmul.mubr.msk.f32.gmra.mrb[14].mxu1 %vm54_vm0, %v395_v45  ;;  %v397_v49 = vmax.f32 %v1820_v46, 0.0 }
 0x103   :  { %v396_v48 = vmax.f32 %v301_v47, 0.0 }
 0x105   :  { %v1823_v50 = vpop.f32.mrb[18].mxu0  ;;  %1876 = vmatprep.mubr.msk.f32.mxu1 %vm54_vm0, %v396_v48 }
 0x106   :  { %v311_v51 = vpop.f32.mrb[19].mxu0  ;;  %1877 = vmatmul.mubr.msk.f32.gmra.mrb[16].mxu1 %vm54_vm0, %v397_v49  ;;  %v399_v53 = vmax.f32 %v1823_v50, 0.0 }
 0x107   :  { %v398_v52 = vmax.f32 %v311_v51, 0.0 }
 0x109   :  { %v1826_v54 = vpop.f32.mrb[20].mxu0  ;;  %1879 = vmatprep.mubr.msk.f32.mxu1 %vm54_vm0, %v398_v52 }
 0x10a   :  { %v321_v55 = vpop.f32.mrb[21].mxu0  ;;  %1880 = vmatmul.mubr.msk.f32.gmra.mrb[18].mxu1 %vm54_vm0, %v399_v53  ;;  %v401_v57 = vmax.f32 %v1826_v54, 0.0 }
 0x10b   :  { %v400_v56 = vmax.f32 %v321_v55, 0.0 }
 0x10d   :  { %v1829_v58 = vpop.f32.mrb[22].mxu0  ;;  %1882 = vmatprep.mubr.msk.f32.mxu1 %vm54_vm0, %v400_v56 }
 0x10e   :  { %v331_v59 = vpop.f32.mrb[23].mxu0  ;;  %1883 = vmatmul.mubr.msk.f32.gmra.mrb[20].mxu1 %vm54_vm0, %v401_v57  ;;  %v403_v61 = vmax.f32 %v1829_v58, 0.0  ;;  %v1126_v57 = vpop.permute.xlu0 %1125 }
 0x10f   :  { %v402_v60 = vmax.f32 %v331_v59, 0.0 }
 0x111   :  { %v1832_v62 = vpop.f32.mrb[24].mxu0  ;;  %1885 = vmatprep.mubr.msk.f32.mxu1 %vm54_vm0, %v402_v60 }
 0x112   :  { %v341_v63 = vpop.f32.mrb[25].mxu0  ;;  %1886 = vmatmul.mubr.msk.f32.gmra.mrb[22].mxu1 %vm54_vm0, %v403_v61  ;;  %v405_v1 = vmax.f32 %v1832_v62, 0.0  ;;  %v2487_v62 = vpop.permute.xlu1 %1131 }
 0x113   :  { %v404_v0 = vmax.f32 %v341_v63, 0.0 }
 0x115   :  { %v1835_v2 = vpop.f32.mrb[26].mxu0  ;;  %1888 = vmatprep.mubr.msk.f32.mxu1 %vm54_vm0, %v404_v0 }
 0x116   :  { %v351_v3 = vpop.f32.mrb[27].mxu0  ;;  %1889 = vmatmul.mubr.msk.f32.gmra.mrb[24].mxu1 %vm54_vm0, %v405_v1  ;;  %v407_v5 = vmax.f32 %v1835_v2, 0.0 }
 0x117   :  { %v406_v4 = vmax.f32 %v351_v3, 0.0 }
 0x119   :  { %v1838_v6 = vpop.f32.mrb[28].mxu0  ;;  %1891 = vmatprep.mubr.msk.f32.mxu1 %vm54_vm0, %v406_v4 }
 0x11a   :  { %v361_v7 = vpop.f32.mrb[29].mxu0  ;;  %1892 = vmatmul.mubr.msk.f32.gmra.mrb[26].mxu1 %vm54_vm0, %v407_v5  ;;  %v409_v9 = vmax.f32 %v1838_v6, 0.0 }
 0x11b   :  { %v408_v8 = vmax.f32 %v361_v7, 0.0 }
 0x11d   :  { %v1841_v10 = vpop.f32.mrb[30].mxu0  ;;  %1894 = vmatprep.mubr.msk.f32.mxu1 %vm54_vm0, %v408_v8 }
 0x11e   :  { %v371_v11 = vpop.f32.mrb[31].mxu0  ;;  %1895 = vmatmul.mubr.msk.f32.gmra.mrb[28].mxu1 %vm54_vm0, %v409_v9  ;;  %v411_v13 = vmax.f32 %v1841_v10, 0.0 }
 0x11f   :  { %v410_v12 = vmax.f32 %v371_v11, 0.0 }
 0x121   :  { %1897 = vmatprep.mubr.msk.f32.mxu1 %vm54_vm0, %v410_v12 }
 0x122   :  { %1898 = vmatmul.mubr.msk.f32.gmra.mrb[30].mxu1 %vm54_vm0, %v411_v13 }
 0x1b9   :  { %v2397_v14 = vpop.f32.mrb[0].mxu1 }
 0x1ba   :  { %v743_v15 = vmul.f32 1.442695, %v2397_v14  ;;  %v2400_v16 = vpop.f32.mrb[1].mxu1 }
 0x1bb   :  { %v741_v17 = vmul.f32 1.442695, %v2400_v16 }
 0x1bc   :  { %1919 = vpow2.f32 %v743_v15 }
 0x1bd   :  { %1921 = vpow2.f32 %v741_v17  ;;  %v2403_v18 = vpop.f32.mrb[2].mxu1 }
 0x1be   :  { %v747_v19 = vmul.f32 1.442695, %v2403_v18  ;;  %v2406_v20 = vpop.f32.mrb[3].mxu1 }
 0x1bf   :  { %v745_v21 = vmul.f32 1.442695, %v2406_v20 }
 0x1c0   :  { %1923 = vpow2.f32 %v747_v19 }
 0x1c1   :  { %1925 = vpow2.f32 %v745_v21  ;;  %v2409_v22 = vpop.f32.mrb[4].mxu1 }
 0x1c2   :  { %v751_v23 = vmul.f32 1.442695, %v2409_v22  ;;  %v2412_v24 = vpop.f32.mrb[5].mxu1 }
 0x1c3   :  { %v749_v25 = vmul.f32 1.442695, %v2412_v24 }
 0x1c4   :  { %1927 = vpow2.f32 %v751_v23  ;;  %v2524_v23 = vpop.permute.xlu0 %1127 }
 0x1c5   :  { %1929 = vpow2.f32 %v749_v25  ;;  %v2415_v26 = vpop.f32.mrb[6].mxu1 }
 0x1c6   :  { %v1920_v27 = vpop.eup %1919  ;;  %v755_v28 = vmul.f32 1.442695, %v2415_v26  ;;  %v2418_v29 = vpop.f32.mrb[7].mxu1 }
 0x1c7   :  { %v1922_v30 = vpop.eup %1921  ;;  %v2420_v31 = vadd.f32 0.0001, %v1920_v27  ;;  %v753_v32 = vmul.f32 1.442695, %v2418_v29 }
 0x1c8   :  { %v2423_v33 = vadd.f32 0.0001, %v1922_v30  ;;  %1931 = vpow2.f32 %v755_v28 }
 0x1c9   :  { %v2428_v34 = vsel %vm1541_vm2, %v2397_v14, %v2420_v31  ;;  %1933 = vpow2.f32 %v753_v32  ;;  %v2430_v35 = vpop.f32.mrb[8].mxu1  ;;  %v849_v5 = vand.u32 2147483648, %v2420_v31  ;;  %vm846_vm7 = vcmp.eq.f32.partialorder %v2420_v31, inf  ;;  %v2535_v32 = vpop.permute.xlu1 %1135 }
 0x1ca   :  { %3352 = vst [vmem:[#allocation2_spill] sm:$0xff] %v2428_v34  ;;  %v1924_v36 = vpop.eup %1923  ;;  %v2435_v37 = vsel %vm1541_vm2, %v2400_v16, %v2423_v33  ;;  %v759_v38 = vmul.f32 1.442695, %v2430_v35  ;;  %v2438_v39 = vpop.f32.mrb[9].mxu1  ;;  %1935 = vrsqrt.f32 %v2423_v33  ;;  %vm839_vm3 = vcmp.eq.f32.partialorder %v2423_v33, inf }
 0x1cb   :  { %3353 = vst [vmem:[#allocation3_spill] sm:$0xff] %v2435_v37  ;;  %v1926_v40 = vpop.eup %1925  ;;  %v2441_v41 = vadd.f32 0.0001, %v1924_v36  ;;  %v757_v42 = vmul.f32 1.442695, %v2438_v39  ;;  %vm841_vm4 = vcmp.eq.f32.partialorder %v2423_v33, 0.0 }
 0x1cc   :  { %v2444_v43 = vadd.f32 0.0001, %v1926_v40  ;;  %1937 = vpow2.f32 %v759_v38  ;;  %v842_v2 = vand.u32 2147483648, %v2423_v33  ;;  %vm848_vm8 = vcmp.eq.f32.partialorder %v2420_v31, 0.0 }
 0x1cd   :  { %v2451_v45 = vsel %vm1541_vm2, %v2403_v18, %v2441_v41  ;;  %1939 = vpow2.f32 %v757_v42  ;;  %v2453_v46 = vpop.f32.mrb[10].mxu1  ;;  %vm860_vm9 = vcmp.eq.f32.partialorder %v2441_v41, inf  ;;  %vm862_vm10 = vcmp.eq.f32.partialorder %v2441_v41, 0.0 }
 0x1ce   :  { %3354 = vst [vmem:[#allocation4_spill] sm:$0xff] %v2451_v45  ;;  %v1928_v47 = vpop.eup %1927  ;;  %v2458_v48 = vsel %vm1541_vm2, %v2406_v20, %v2444_v43  ;;  %v763_v49 = vmul.f32 1.442695, %v2453_v46  ;;  %v2461_v50 = vpop.f32.mrb[11].mxu1  ;;  %1941 = vrsqrt.f32 %v2444_v43  ;;  %vm853_vm5 = vcmp.eq.f32.partialorder %v2444_v43, inf }
 0x1cf   :  { %3355 = vst [vmem:[#allocation5_spill] sm:$0xff] %v2458_v48  ;;  %v1930_v51 = vpop.eup %1929  ;;  %v2464_v52 = vadd.f32 0.0001, %v1928_v47  ;;  %v761_v53 = vmul.f32 1.442695, %v2461_v50  ;;  %vm855_vm6 = vcmp.eq.f32.partialorder %v2444_v43, 0.0 }
 0x1d0   :  { %v2467_v54 = vadd.f32 0.0001, %v1930_v51  ;;  %1943 = vpow2.f32 %v763_v49  ;;  %v856_v13 = vand.u32 2147483648, %v2444_v43  ;;  %v863_v30 = vand.u32 2147483648, %v2441_v41 }
 0x1d1   :  { %v2472_v55 = vsel %vm1541_vm2, %v2409_v22, %v2464_v52  ;;  %1945 = vpow2.f32 %v761_v53  ;;  %v2474_v56 = vpop.f32.mrb[12].mxu1  ;;  %vm874_vm11 = vcmp.eq.f32.partialorder %v2464_v52, inf  ;;  %vm876_vm13 = vcmp.eq.f32.partialorder %v2464_v52, 0.0 }
 0x1d2   :  { %3356 = vst [vmem:[#allocation6_spill] sm:$0xff] %v2472_v55  ;;  %v1932_v58 = vpop.eup %1931  ;;  %v2480_v59 = vsel %vm1541_vm2, %v2412_v24, %v2467_v54  ;;  %v767_v60 = vmul.f32 1.442695, %v2474_v56  ;;  %v2483_v61 = vpop.f32.mrb[13].mxu1  ;;  %1947 = vrsqrt.f32 %v2420_v31  ;;  %vm867_vm12 = vcmp.eq.f32.partialorder %v2467_v54, inf }
 0x1d3   :  { %3357 = vst [vmem:[#allocation7_spill] sm:$0xff] %v2480_v59  ;;  %v1934_v63 = vpop.eup %1933  ;;  %v2489_v0 = vadd.f32 0.0001, %v1932_v58  ;;  %v765_v1 = vmul.f32 1.442695, %v2483_v61  ;;  %1949 = vrsqrt.f32 %v2441_v41  ;;  %vm869_vm14 = vcmp.eq.f32.partialorder %v2467_v54, 0.0 }
 0x1d4   :  { %v1936_v3 = vpop.eup %1935  ;;  %v2494_v4 = vadd.f32 0.0001, %v1934_v63  ;;  %1951 = vpow2.f32 %v767_v60 }
 0x1d5   :  { %v2501_v6 = vsel %vm1541_vm2, %v2415_v26, %v2489_v0  ;;  %1953 = vpow2.f32 %v765_v1  ;;  %v838_v7 = vmul.f32 %v1936_v3, %v2423_v33  ;;  %v2504_v8 = vpop.f32.mrb[14].mxu1  ;;  %v2563_v1 = vpop.permute.xlu0 %1133  ;;  %vm888_vm15 = vcmp.eq.f32.partialorder %v2489_v0, inf }
 0x1d6   :  { %3358 = vst [vmem:[#allocation8_spill] sm:$0xff] %v2501_v6  ;;  %v1938_v9 = vpop.eup %1937  ;;  %v2510_v10 = vsel %vm1541_vm2, %v2418_v29, %v2494_v4  ;;  %v771_v11 = vmul.f32 1.442695, %v2504_v8  ;;  %v2513_v12 = vpop.f32.mrb[15].mxu1  ;;  %1955 = vrsqrt.f32 %v2464_v52  ;;  %vm890_vm0 = vcmp.eq.f32.partialorder %v2489_v0, 0.0 }
 0x1d7   :  { %3359 = vst [vmem:[#allocation9_spill] sm:$0xff] %v2510_v10  ;;  %v1940_v15 = vpop.eup %1939  ;;  %v2518_v17 = vadd.f32 0.0001, %v1938_v9  ;;  %v840_v19 = vsel %vm839_vm3, %v2423_v33, %v838_v7  ;;  %v769_v21 = vmul.f32 1.442695, %v2513_v12  ;;  %1957 = vrsqrt.f32 %v2467_v54 }
 0x1d8   :  { %v1942_v25 = vpop.eup %1941  ;;  %v2529_v27 = vadd.f32 0.0001, %v1940_v15  ;;  %v843_v28 = vsel %vm841_vm4, %v842_v2, %v840_v19  ;;  %1959 = vpow2.f32 %v771_v11  ;;  %v870_v9 = vand.u32 2147483648, %v2467_v54 }
 0x1d9   :  { %v2540_v36 = vsel %vm1541_vm2, %v2430_v35, %v2518_v17  ;;  %v1221_v38 = vmul.f32 %v1126_v57, %v843_v28  ;;  %1961 = vpow2.f32 %v769_v21  ;;  %v852_v40 = vmul.f32 %v1942_v25, %v2444_v43  ;;  %v2543_v42 = vpop.f32.mrb[16].mxu1 }
 0x1da   :  { %3360 = vst [vmem:[#allocation10_spill] sm:$0xff] %v2540_v36  ;;  %v1944_v33 = vpop.eup %1943  ;;  %v2548_v47 = vsel %vm1541_vm2, %v2438_v39, %v2529_v27  ;;  %v775_v49 = vmul.f32 1.442695, %v2543_v42  ;;  %v2551_v51 = vpop.f32.mrb[17].mxu1  ;;  %1963 = vrsqrt.f32 %v2489_v0  ;;  %vm881_vm1 = vcmp.eq.f32.partialorder %v2494_v4, inf }
 0x1db   :  { %3361 = vst [vmem:[#allocation11_spill] sm:$0xff] %v2548_v47  ;;  %v1946_v57 = vpop.eup %1945  ;;  %v2555_v58 = vadd.f32 0.0001, %v1944_v33  ;;  %v854_v60 = vsel %vm853_vm5, %v2444_v43, %v852_v40  ;;  %v773_v63 = vmul.f32 1.442695, %v2551_v51  ;;  %1285 = vrot.lane.b32.xlu0 %v1221_v38, %s2048_s1  ;;  %1965 = vrsqrt.f32 %v2494_v4  ;;  %v2592_v33 = vpop.permute.xlu1 %1139 }
 0x1dc   :  { %v1948_v2 = vpop.eup %1947  ;;  %v2567_v3 = vadd.f32 0.0001, %v1946_v57  ;;  %v857_v7 = vsel %vm855_vm6, %v856_v13, %v854_v60  ;;  %1967 = vpow2.f32 %v775_v49  ;;  %vm883_vm3 = vcmp.eq.f32.partialorder %v2494_v4, 0.0 }
 0x1dd   :  { %v1950_v11 = vpop.eup %1949  ;;  %v2577_v15 = vsel %vm1541_vm2, %v2453_v46, %v2555_v58  ;;  %v1223_v19 = vmul.f32 %v2446_v44, %v857_v7  ;;  %v845_v21 = vmul.f32 %v1948_v2, %v2420_v31  ;;  %1969 = vpow2.f32 %v773_v63  ;;  %v2581_v43 = vpop.f32.mrb[18].mxu1 }
 0x1de   :  { %3362 = vst [vmem:[#allocation12_spill] sm:$0xff] %v2577_v15  ;;  %v1952_v13 = vpop.eup %1951  ;;  %v2586_v25 = vsel %vm1541_vm2, %v2461_v50, %v2567_v3  ;;  %v859_v28 = vmul.f32 %v1950_v11, %v2441_v41  ;;  %v779_v38 = vmul.f32 1.442695, %v2581_v43  ;;  %v2590_v40 = vpop.f32.mrb[19].mxu1  ;;  %1971 = vrsqrt.f32 %v2518_v17 }
 0x1df   :  { %3363 = vst [vmem:[#allocation13_spill] sm:$0xff] %v2586_v25  ;;  %v1954_v49 = vpop.eup %1953  ;;  %v2595_v57 = vadd.f32 0.0001, %v1952_v13  ;;  %v847_v60 = vsel %vm846_vm7, %v2420_v31, %v845_v21  ;;  %v777_v63 = vmul.f32 1.442695, %v2590_v40  ;;  %1289 = vrot.lane.b32.xlu0 %v1223_v19, %s2048_s1  ;;  %vm902_vm4 = vcmp.eq.f32.partialorder %v2518_v17, inf }
 0x1e0   :  { %v1956_v2 = vpop.eup %1955  ;;  %v2603_v7 = vadd.f32 0.0001, %v1954_v49  ;;  %v850_v11 = vsel %vm848_vm8, %v849_v5, %v847_v60  ;;  %v861_v13 = vsel %vm860_vm9, %v2441_v41, %v859_v28  ;;  %1973 = vpow2.f32 %v779_v38  ;;  %v1138_v5 = vpop.permute.xlu0 %1137 }
 0x1e1   :  { %v1958_v21 = vpop.eup %1957  ;;  %v2616_v19 = vsel %vm1541_vm2, %v2474_v56, %v2595_v57  ;;  %v1222_v49 = vmul.f32 %v2524_v23, %v850_v11  ;;  %v864_v44 = vsel %vm862_vm10, %v863_v30, %v861_v13  ;;  %1975 = vpow2.f32 %v777_v63  ;;  %v2621_v31 = vpop.f32.mrb[20].mxu1 }
 0x1e2   :  { %3364 = vst [vmem:[#allocation14_spill] sm:$0xff] %v2616_v19  ;;  %v1960_v28 = vpop.eup %1959  ;;  %v2627_v38 = vsel %vm1541_vm2, %v2483_v61, %v2603_v7  ;;  %v1224_v60 = vmul.f32 %v2487_v62, %v864_v44  ;;  %v873_v53 = vmul.f32 %v1956_v2, %v2464_v52  ;;  %v866_v23 = vmul.f32 %v1958_v21, %v2467_v54  ;;  %v2632_v41 = vpop.f32.mrb[21].mxu1 }
 0x1e3   :  { %3365 = vst [vmem:[#allocation15_spill] sm:$0xff] %v2627_v38  ;;  %3366 = vst [vmem:[#allocation16_spill] sm:$0xff] %v2632_v41  ;;  %v1962_v30 = vpop.eup %1961  ;;  %v2634_v63 = vadd.f32 0.0001, %v1960_v28  ;;  %1287 = vrot.lane.b32.xlu1 %v1222_v49, %s2048_s1  ;;  %v783_v11 = vmul.f32 1.442695, %v2621_v31  ;;  %1977 = vrsqrt.f32 %v2529_v27  ;;  %v2649_v2 = vpop.permute.xlu1 %1143 }
 0x1e4   :  { %v781_v13 = vmul.f32 1.442695, %v2632_v41  ;;  %v1964_v38 = vpop.eup %1963  ;;  %v2640_v19 = vadd.f32 0.0001, %v1962_v30  ;;  %v875_v62 = vsel %vm874_vm11, %v2464_v52, %v873_v53  ;;  %v868_v44 = vsel %vm867_vm12, %v2467_v54, %v866_v23 }
 0x1e5   :  { %v1966_v21 = vpop.eup %1965  ;;  %v2654_v49 = vsel %vm1541_vm2, %v2504_v8, %v2634_v63  ;;  %v3368_v28 = vand.u32 2147483648, %v2464_v52  ;;  %v871_v53 = vsel %vm869_vm14, %v870_v9, %v868_v44  ;;  %1979 = vpow2.f32 %v783_v11  ;;  %v2662_v23 = vpop.f32.mrb[22].mxu1 }
 0x1e6   :  { %3367 = vst [vmem:[#allocation17_spill] sm:$0xff] %v2654_v49  ;;  %3369 = vst [vmem:[#allocation18_spill] sm:$0xff] %v2662_v23  ;;  %v1968_v25 = vpop.eup %1967  ;;  %v2667_v15 = vsel %vm1541_vm2, %v2513_v12, %v2640_v19  ;;  %v1225_v49 = vmul.f32 %v2563_v1, %v871_v53  ;;  %1981 = vpow2.f32 %v781_v13  ;;  %v2671_v36 = vpop.f32.mrb[23].mxu1  ;;  %v887_v54 = vmul.f32 %v1964_v38, %v2489_v0 }
 0x1e7   :  { %v878_v30 = vsel %vm876_vm13, %v3368_v28, %v875_v62  ;;  %3370 = vst [vmem:[#allocation19_spill] sm:$0xff] %v2667_v15  ;;  %3371 = vst [vmem:[#allocation20_spill] sm:$0xff] %v2671_v36  ;;  %v1970_v52 = vpop.eup %1969  ;;  %v2673_v62 = vadd.f32 0.0001, %v1968_v25  ;;  %1291 = vrot.lane.b32.xlu1 %v1224_v60, %s2048_s1  ;;  %v880_v9 = vmul.f32 %v1966_v21, %v2494_v4  ;;  %v787_v11 = vmul.f32 1.442695, %v2662_v23  ;;  %v1142_v44 = vpop.permute.xlu0 %1141 }
 0x1e8   :  { %v1226_v47 = vmul.f32 %v2535_v32, %v878_v30  ;;  %v2679_v28 = vadd.f32 0.0001, %v1970_v52  ;;  %1293 = vrot.lane.b32.xlu0 %v1225_v49, %s2048_s1  ;;  %v884_v32 = vand.u32 2147483648, %v2494_v4  ;;  %v785_v1 = vmul.f32 1.442695, %v2671_v36  ;;  %v1972_v25 = vpop.eup %1971  ;;  %v2709_v15 = vpop.permute.xlu1 %1147 }
 0x1e9   :  { %v2688_v38 = vsel %vm1541_vm2, %v2543_v42, %v2673_v62  ;;  %v889_v60 = vsel %vm888_vm15, %v2489_v0, %v887_v54  ;;  %v882_v13 = vsel %vm881_vm1, %v2494_v4, %v880_v9  ;;  %1983 = vpow2.f32 %v787_v11  ;;  %v2696_v21 = vpop.f32.mrb[24].mxu1 }
 0x1ea   :  { %3372 = vst [vmem:[#allocation21_spill] sm:$0xff] %v2688_v38  ;;  %v1974_v49 = vpop.eup %1973  ;;  %v2701_v30 = vsel %vm1541_vm2, %v2551_v51, %v2679_v28  ;;  %v3374_v53 = vand.u32 2147483648, %v2489_v0  ;;  %v885_v38 = vsel %vm883_vm3, %v884_v32, %v882_v13  ;;  %1985 = vpow2.f32 %v785_v1  ;;  %v2707_v54 = vpop.f32.mrb[25].mxu1 }
 0x1eb   :  { %3373 = vst [vmem:[#allocation22_spill] sm:$0xff] %v2701_v30  ;;  %v1976_v4 = vpop.eup %1975  ;;  %v2711_v9 = vadd.f32 0.0001, %v1974_v49  ;;  %1295 = vrot.lane.b32.xlu1 %v1226_v47, %s2048_s1  ;;  %v1227_v6 = vmul.f32 %v1138_v5, %v885_v38  ;;  %v901_v30 = vmul.f32 %v1972_v25, %v2518_v17  ;;  %vm904_vm5 = vcmp.eq.f32.partialorder %v2518_v17, 0.0  ;;  %v2730_v25 = vpop.permute.xlu0 %1145 }
 0x1ec   :  { %v892_v52 = vsel %vm890_vm0, %v3374_v53, %v889_v60  ;;  %v2716_v10 = vadd.f32 0.0001, %v1976_v4  ;;  %v905_v0 = vand.u32 2147483648, %v2518_v17  ;;  %v789_v5 = vmul.f32 1.442695, %v2707_v54 }
 0x1ed   :  { %v1228_v11 = vmul.f32 %v2592_v33, %v892_v52  ;;  %v1978_v32 = vpop.eup %1977  ;;  %v2724_v1 = vsel %vm1541_vm2, %v2581_v43, %v2711_v9  ;;  %v903_v47 = vsel %vm902_vm4, %v2518_v17, %v901_v30  ;;  %1297 = vrot.lane.b32.xlu0 %v1227_v6, %s2048_s1  ;;  %v791_v33 = vmul.f32 1.442695, %v2696_v21  ;;  %v2732_v38 = vpop.f32.mrb[26].mxu1 }
 0x1ee   :  { %3375 = vst [vmem:[#allocation23_spill] sm:$0xff] %v2724_v1  ;;  %v2737_v60 = vsel %vm1541_vm2, %v2590_v40, %v2716_v10  ;;  %v906_v13 = vsel %vm904_vm5, %v905_v0, %v903_v47  ;;  %v894_v49 = vmul.f32 %v1978_v32, %v2529_v27  ;;  %1987 = vrsqrt.f32 %v2555_v58  ;;  %v2741_v17 = vpop.f32.mrb[27].mxu1  ;;  %v2751_v32 = vpop.permute.xlu1 %1151 }
 0x1ef   :  { %3376 = vst [vmem:[#allocation24_spill] sm:$0xff] %v2737_v60  ;;  %3377 = vst [vmem:[#allocation25_spill] sm:$0xff] %v2741_v17  ;;  %v1980_v6 = vpop.eup %1979  ;;  %1299 = vrot.lane.b32.xlu1 %v1228_v11, %s2048_s1  ;;  %v1230_v30 = vmul.f32 %v2649_v2, %v906_v13  ;;  %vm895_vm6 = vcmp.eq.f32.partialorder %v2529_v27, inf  ;;  %v898_v53 = vand.u32 2147483648, %v2529_v27  ;;  %1989 = vpow2.f32 %v791_v33 }
 0x1f0   :  { %v1982_v52 = vpop.eup %1981  ;;  %v2747_v4 = vadd.f32 0.0001, %v1980_v6  ;;  %v896_v0 = vsel %vm895_vm6, %v2529_v27, %v894_v49  ;;  %vm897_vm7 = vcmp.eq.f32.partialorder %v2529_v27, 0.0  ;;  %1991 = vpow2.f32 %v789_v5 }
 0x1f1   :  { %v2753_v47 = vadd.f32 0.0001, %v1982_v52  ;;  %v899_v11 = vsel %vm897_vm7, %v898_v53, %v896_v0  ;;  %1993 = vrsqrt.f32 %v2567_v3  ;;  %v2756_v2 = vpop.f32.mrb[28].mxu1  ;;  %v795_v5 = vmul.f32 1.442695, %v2732_v38  ;;  %v2774_v52 = vpop.permute.xlu0 %1149 }
 0x1f2   :  { %3378 = vst [vmem:[#allocation26_spill] sm:$0xff] %v2756_v2  ;;  %v2761_v33 = vsel %vm1541_vm2, %v2621_v31, %v2747_v4  ;;  %v1229_v13 = vmul.f32 %v1142_v44, %v899_v11  ;;  %v2763_v6 = vpop.f32.mrb[29].mxu1  ;;  %v793_v53 = vmul.f32 1.442695, %v2741_v17  ;;  %1995 = vrsqrt.f32 %v2595_v57  ;;  %v2789_v60 = vpop.permute.xlu1 %1155 }
 0x1f3   :  { %3379 = vst [vmem:[#allocation27_spill] sm:$0xff] %v2761_v33  ;;  %3380 = vst [vmem:[#allocation28_spill] sm:$0xff] %v2763_v6  ;;  %v1984_v49 = vpop.eup %1983  ;;  %v2768_v27 = vsel %vm1541_vm2, %v2632_v41, %v2753_v47  ;;  %1303 = vrot.lane.b32.xlu1 %v1230_v30, %s2048_s1  ;;  %1997 = vpow2.f32 %v795_v5  ;;  %vm916_vm8 = vcmp.eq.f32.partialorder %v2555_v58, inf  ;;  %vm918_vm9 = vcmp.eq.f32.partialorder %v2555_v58, 0.0 }
 0x1f4   :  { %3381 = vst [vmem:[#allocation29_spill] sm:$0xff] %v2768_v27  ;;  %v1986_v0 = vpop.eup %1985  ;;  %v2776_v44 = vadd.f32 0.0001, %v1984_v49  ;;  %1301 = vrot.lane.b32.xlu0 %v1229_v13, %s2048_s1  ;;  %1999 = vpow2.f32 %v793_v53  ;;  %v799_v27 = vmul.f32 1.442695, %v2756_v2  ;;  %v919_v53 = vand.u32 2147483648, %v2555_v58 }
 0x1f5   :  { %v2779_v11 = vadd.f32 0.0001, %v1986_v0  ;;  %v2781_v33 = vpop.f32.mrb[30].mxu1  ;;  %2001 = vrsqrt.f32 %v2603_v7  ;;  %v797_v49 = vmul.f32 1.442695, %v2763_v6  ;;  %vm909_vm10 = vcmp.eq.f32.partialorder %v2567_v3, inf  ;;  %v2807_v55 = vpop.permute.xlu0 %1153 }
 0x1f6   :  { %v2786_v30 = vsel %vm1541_vm2, %v2662_v23, %v2776_v44  ;;  %v2791_v1 = vpop.f32.mrb[31].mxu1  ;;  %2003 = vpow2.f32 %v799_v27  ;;  %vm911_vm11 = vcmp.eq.f32.partialorder %v2567_v3, 0.0  ;;  %v803_v34 = vmul.f32 1.442695, %v2781_v33 }
 0x1f7   :  { %3382 = vst [vmem:[#allocation30_spill] sm:$0xff] %v2786_v30  ;;  %v2796_v13 = vsel %vm1541_vm2, %v2671_v36, %v2779_v11  ;;  %2005 = vpow2.f32 %v797_v49  ;;  %v801_v48 = vmul.f32 1.442695, %v2791_v1  ;;  %vm930_vm12 = vcmp.eq.f32.partialorder %v2595_v57, inf }
 0x1f8   :  { %3383 = vst [vmem:[#allocation31_spill] sm:$0xff] %v2796_v13  ;;  %v1988_v5 = vpop.eup %1987  ;;  %v912_v13 = vand.u32 2147483648, %v2567_v3  ;;  %2007 = vrsqrt.f32 %v2634_v63  ;;  %vm932_vm13 = vcmp.eq.f32.partialorder %v2595_v57, 0.0  ;;  %vm923_vm14 = vcmp.eq.f32.partialorder %v2603_v7, inf }
 0x1f9   :  { %v1990_v0 = vpop.eup %1989  ;;  %v915_v30 = vmul.f32 %v1988_v5, %v2555_v58  ;;  %2009 = vrsqrt.f32 %v2640_v19  ;;  %vm925_vm15 = vcmp.eq.f32.partialorder %v2603_v7, 0.0  ;;  %vm944_vm0 = vcmp.eq.f32.partialorder %v2634_v63, inf }
 0x1fa   :  { %v1992_v59 = vpop.eup %1991  ;;  %v2809_v45 = vadd.f32 0.0001, %v1990_v0  ;;  %2011 = vpow2.f32 %v803_v34  ;;  %v933_v34 = vand.u32 2147483648, %v2595_v57  ;;  %vm946_vm1 = vcmp.eq.f32.partialorder %v2634_v63, 0.0 }
 0x1fb   :  { %v1994_v27 = vpop.eup %1993  ;;  %v2814_v37 = vadd.f32 0.0001, %v1992_v59  ;;  %v917_v5 = vsel %vm916_vm8, %v2555_v58, %v915_v30  ;;  %v2829_v59 = vpop.permute.xlu1 %1159  ;;  %2013 = vpow2.f32 %v801_v48  ;;  %vm937_vm3 = vcmp.eq.f32.partialorder %v2640_v19, inf }
 0x1fc   :  { %v2824_v49 = vsel %vm1541_vm2, %v2696_v21, %v2809_v45  ;;  %v920_v0 = vsel %vm918_vm9, %v919_v53, %v917_v5  ;;  %v908_v36 = vmul.f32 %v1994_v27, %v2567_v3  ;;  %v1996_v23 = vpop.eup %1995  ;;  %2015 = vrsqrt.f32 %v2673_v62  ;;  %v2849_v48 = vpop.permute.xlu0 %1157 }
 0x1fd   :  { %3384 = vst [vmem:[#allocation32_spill] sm:$0xff] %v2824_v49  ;;  %v2834_v30 = vsel %vm1541_vm2, %v2707_v54, %v2814_v37  ;;  %v1232_v41 = vmul.f32 %v2709_v15, %v920_v0  ;;  %v929_v53 = vmul.f32 %v1996_v23, %v2595_v57  ;;  %v1998_v27 = vpop.eup %1997  ;;  %2017 = vrsqrt.f32 %v2679_v28 }
 0x1fe   :  { %3385 = vst [vmem:[#allocation33_spill] sm:$0xff] %v2834_v30  ;;  %v910_v58 = vsel %vm909_vm10, %v2567_v3, %v908_v36  ;;  %v2000_v36 = vpop.eup %1999  ;;  %v2853_v23 = vadd.f32 0.0001, %v1998_v27  ;;  %2019 = vrsqrt.f32 %v2711_v9  ;;  %vm939_vm4 = vcmp.eq.f32.partialorder %v2640_v19, 0.0 }
 0x1ff   :  { %v913_v5 = vsel %vm911_vm11, %v912_v13, %v910_v58  ;;  %1307 = vrot.lane.b32.xlu1 %v1232_v41, %s2048_s1  ;;  %v931_v3 = vsel %vm930_vm12, %v2595_v57, %v929_v53  ;;  %v926_v13 = vand.u32 2147483648, %v2603_v7  ;;  %v2002_v41 = vpop.eup %2001  ;;  %v2859_v0 = vadd.f32 0.0001, %v2000_v36  ;;  %v2874_v57 = vpop.permute.xlu1 %1163 }
 0x200   :  { %v1231_v15 = vmul.f32 %v2730_v25, %v913_v5  ;;  %v934_v58 = vsel %vm932_vm13, %v933_v34, %v931_v3  ;;  %v2004_v30 = vpop.eup %2003  ;;  %v2868_v25 = vsel %vm1541_vm2, %v2732_v38, %v2853_v23  ;;  %v922_v27 = vmul.f32 %v2002_v41, %v2603_v7 }
 0x201   :  { %3386 = vst [vmem:[#allocation34_spill] sm:$0xff] %v2868_v25  ;;  %v1234_v53 = vmul.f32 %v2751_v32, %v934_v58  ;;  %v2006_v34 = vpop.eup %2005  ;;  %v2879_v5 = vsel %vm1541_vm2, %v2741_v17, %v2859_v0  ;;  %v2881_v36 = vadd.f32 0.0001, %v2004_v30  ;;  %v947_v3 = vand.u32 2147483648, %v2634_v63 }
 0x202   :  { %1305 = vrot.lane.b32.xlu0 %v1231_v15, %s2048_s1  ;;  %3387 = vst [vmem:[#allocation35_spill] sm:$0xff] %v2879_v5  ;;  %2021 = vrsqrt.f32 %v2716_v10  ;;  %v2008_v32 = vpop.eup %2007  ;;  %v924_v15 = vsel %vm923_vm14, %v2603_v7, %v922_v27  ;;  %v2889_v41 = vadd.f32 0.0001, %v2006_v34  ;;  %v940_v27 = vand.u32 2147483648, %v2640_v19 }
 0x203   :  { %1311 = vrot.lane.b32.xlu1 %v1234_v53, %s2048_s1  ;;  %v2010_v58 = vpop.eup %2009  ;;  %v927_v30 = vsel %vm925_vm15, %v926_v13, %v924_v15  ;;  %v2898_v5 = vsel %vm1541_vm2, %v2756_v2, %v2881_v36  ;;  %v943_v25 = vmul.f32 %v2008_v32, %v2634_v63  ;;  %v2902_v53 = vpop.permute.xlu0 %1161  ;;  %2023 = vrsqrt.f32 %v2747_v4 }
 0x204   :  { %3388 = vst [vmem:[#allocation36_spill] sm:$0xff] %v2898_v5  ;;  %v2012_v34 = vpop.eup %2011  ;;  %v1233_v49 = vmul.f32 %v2774_v52, %v927_v30  ;;  %v2908_v17 = vsel %vm1541_vm2, %v2763_v6, %v2889_v41  ;;  %v936_v7 = vmul.f32 %v2010_v58, %v2640_v19  ;;  %vm958_vm5 = vcmp.eq.f32.partialorder %v2673_v62, inf }
 0x205   :  { %3389 = vst [vmem:[#allocation37_spill] sm:$0xff] %v2908_v17  ;;  %v2014_v13 = vpop.eup %2013  ;;  %v945_v32 = vsel %vm944_vm0, %v2634_v63, %v943_v25  ;;  %v2915_v15 = vadd.f32 0.0001, %v2012_v34  ;;  %vm960_vm6 = vcmp.eq.f32.partialorder %v2673_v62, 0.0  ;;  %v961_v25 = vand.u32 2147483648, %v2673_v62  ;;  %v1168_v34 = vpop.permute.xlu1 %1167 }
 0x206   :  { %v2016_v52 = vpop.eup %2015  ;;  %v948_v30 = vsel %vm946_vm1, %v947_v3, %v945_v32  ;;  %1309 = vrot.lane.b32.xlu0 %v1233_v49, %s2048_s1  ;;  %v938_v58 = vsel %vm937_vm3, %v2640_v19, %v936_v7  ;;  %v2925_v17 = vadd.f32 0.0001, %v2014_v13  ;;  %2025 = vrsqrt.f32 %v2753_v47 }
 0x207   :  { %v2018_v5 = vpop.eup %2017  ;;  %v1236_v6 = vmul.f32 %v2789_v60, %v948_v30  ;;  %v941_v2 = vsel %vm939_vm4, %v940_v27, %v938_v58  ;;  %v2934_v63 = vsel %vm1541_vm2, %v2781_v33, %v2915_v15  ;;  %v957_v49 = vmul.f32 %v2016_v52, %v2673_v62 }
 0x208   :  { %v1235_v3 = vmul.f32 %v2807_v55, %v941_v2  ;;  %v2941_v7 = vsel %vm1541_vm2, %v2791_v1, %v2925_v17  ;;  %v950_v13 = vmul.f32 %v2018_v5, %v2679_v28  ;;  %v2020_v19 = vpop.eup %2019  ;;  %vm951_vm7 = vcmp.eq.f32.partialorder %v2679_v28, inf  ;;  %v2952_v2 = vpop.permute.xlu0 %1165 }
 0x209   :  { %1315 = vrot.lane.b32.xlu1 %v1236_v6, %s2048_s1  ;;  %v959_v60 = vsel %vm958_vm5, %v2673_v62, %v957_v49  ;;  %vm953_vm8 = vcmp.eq.f32.partialorder %v2679_v28, 0.0  ;;  %v954_v55 = vand.u32 2147483648, %v2679_v28  ;;  %v971_v6 = vmul.f32 %v2020_v19, %v2711_v9 }
 0x20a   :  { %v962_v5 = vsel %vm960_vm6, %v961_v25, %v959_v60  ;;  %1313 = vrot.lane.b32.xlu0 %v1235_v3, %s2048_s1  ;;  %v952_v27 = vsel %vm951_vm7, %v2679_v28, %v950_v13  ;;  %2027 = vrsqrt.f32 %v2776_v44  ;;  %vm972_vm2 = vcmp.eq.f32.partialorder %v2711_v9, inf  ;;  %v1172_v25 = vpop.permute.xlu1 %1171 }
 0x20b   :  { %v1238_v52 = vmul.f32 %v2829_v59, %v962_v5  ;;  %v955_v30 = vsel %vm953_vm8, %v954_v55, %v952_v27  ;;  %v975_v58 = vand.u32 2147483648, %v2711_v9  ;;  %v973_v62 = vsel %vm972_vm2, %v2711_v9, %v971_v6 }
 0x20c   :  { %v2022_v32 = vpop.eup %2021  ;;  %v1237_v49 = vmul.f32 %v2849_v48, %v955_v30  ;;  %vm974_vm9 = vcmp.eq.f32.partialorder %v2711_v9, 0.0  ;;  %vm965_vm10 = vcmp.eq.f32.partialorder %v2716_v10, inf  ;;  %v968_v59 = vand.u32 2147483648, %v2716_v10  ;;  %v1170_v55 = vpop.permute.xlu0 %1169 }
 0x20d   :  { %v964_v28 = vmul.f32 %v2022_v32, %v2716_v10  ;;  %1319 = vrot.lane.b32.xlu1 %v1238_v52, %s2048_s1  ;;  %v976_v3 = vsel %vm974_vm9, %v975_v58, %v973_v62  ;;  %2029 = vrsqrt.f32 %v2779_v11  ;;  %v2024_v13 = vpop.eup %2023  ;;  %vm967_vm11 = vcmp.eq.f32.partialorder %v2716_v10, 0.0 }
 0x20e   :  { %v1240_v19 = vmul.f32 %v2874_v57, %v976_v3  ;;  %1317 = vrot.lane.b32.xlu0 %v1237_v49, %s2048_s1  ;;  %2031 = vrsqrt.f32 %v2809_v45  ;;  %v985_v60 = vmul.f32 %v2024_v13, %v2747_v4  ;;  %vm986_vm12 = vcmp.eq.f32.partialorder %v2747_v4, inf }
 0x20f   :  { %v966_v48 = vsel %vm965_vm10, %v2716_v10, %v964_v28  ;;  %v989_v27 = vand.u32 2147483648, %v2747_v4  ;;  %2033 = vrsqrt.f32 %v2814_v37  ;;  %vm988_vm13 = vcmp.eq.f32.partialorder %v2747_v4, 0.0 }
 0x210   :  { %v969_v9 = vsel %vm967_vm11, %v968_v59, %v966_v48  ;;  %v987_v57 = vsel %vm986_vm12, %v2747_v4, %v985_v60  ;;  %2035 = vrsqrt.f32 %v2853_v23  ;;  %v2026_v10 = vpop.eup %2025  ;;  %vm979_vm14 = vcmp.eq.f32.partialorder %v2753_v47, inf  ;;  %v1174_v62 = vpop.permute.xlu0 %1173 }
 0x211   :  { %v1239_v5 = vmul.f32 %v2902_v53, %v969_v9  ;;  %1323 = vrot.lane.b32.xlu1 %v1240_v19, %s2048_s1  ;;  %v990_v6 = vsel %vm988_vm13, %v989_v27, %v987_v57  ;;  %vm981_vm15 = vcmp.eq.f32.partialorder %v2753_v47, 0.0  ;;  %v1176_v53 = vpop.permute.xlu1 %1175  ;;  %v978_v52 = vmul.f32 %v2026_v10, %v2753_v47 }
 0x212   :  { %v1242_v32 = vmul.f32 %v1168_v34, %v990_v6  ;;  %v982_v30 = vand.u32 2147483648, %v2753_v47  ;;  %2037 = vrsqrt.f32 %v2859_v0  ;;  %vm1000_vm0 = vcmp.eq.f32.partialorder %v2776_v44, inf }
 0x213   :  { %1321 = vrot.lane.b32.xlu0 %v1239_v5, %s2048_s1  ;;  %vm1002_vm1 = vcmp.eq.f32.partialorder %v2776_v44, 0.0  ;;  %v1003_v4 = vand.u32 2147483648, %v2776_v44  ;;  %2039 = vrsqrt.f32 %v2881_v36  ;;  %v980_v49 = vsel %vm979_vm14, %v2753_v47, %v978_v52 }
 0x214   :  { %v2028_v58 = vpop.eup %2027  ;;  %vm993_vm3 = vcmp.eq.f32.partialorder %v2779_v11, inf  ;;  %vm995_vm4 = vcmp.eq.f32.partialorder %v2779_v11, 0.0  ;;  %v983_v28 = vsel %vm981_vm15, %v982_v30, %v980_v49  ;;  %v996_v3 = vand.u32 2147483648, %v2779_v11 }
 0x215   :  { %1327 = vrot.lane.b32.xlu1 %v1242_v32, %s2048_s1  ;;  %v999_v34 = vmul.f32 %v2028_v58, %v2776_v44  ;;  %vm1014_vm5 = vcmp.eq.f32.partialorder %v2809_v45, inf  ;;  %2041 = vrsqrt.f32 %v2889_v41  ;;  %v1241_v13 = vmul.f32 %v2952_v2, %v983_v28  ;;  %v1180_v5 = vpop.permute.xlu1 %1179  ;;  %v1178_v58 = vpop.permute.xlu0 %1177 }
 0x216   :  { %vm1016_vm6 = vcmp.eq.f32.partialorder %v2809_v45, 0.0  ;;  %2043 = vrsqrt.f32 %v2915_v15  ;;  %v1017_v60 = vand.u32 2147483648, %v2809_v45  ;;  %vm1007_vm7 = vcmp.eq.f32.partialorder %v2814_v37, inf }
 0x217   :  { %v2030_v59 = vpop.eup %2029  ;;  %v1001_v19 = vsel %vm1000_vm0, %v2776_v44, %v999_v34  ;;  %1325 = vrot.lane.b32.xlu0 %v1241_v13, %s2048_s1  ;;  %vm1009_vm8 = vcmp.eq.f32.partialorder %v2814_v37, 0.0  ;;  %2045 = vrsqrt.f32 %v2925_v17  ;;  %v1010_v10 = vand.u32 2147483648, %v2814_v37 }
 0x218   :  { %v2032_v48 = vpop.eup %2031  ;;  %v1004_v47 = vsel %vm1002_vm1, %v1003_v4, %v1001_v19  ;;  %v992_v9 = vmul.f32 %v2030_v59, %v2779_v11  ;;  %vm1028_vm2 = vcmp.eq.f32.partialorder %v2853_v23, inf  ;;  %vm1030_vm9 = vcmp.eq.f32.partialorder %v2853_v23, 0.0 }
 0x219   :  { %v1244_v2 = vmul.f32 %v1172_v25, %v1004_v47  ;;  %v1013_v27 = vmul.f32 %v2032_v48, %v2809_v45  ;;  %v2034_v57 = vpop.eup %2033  ;;  %v1031_v30 = vand.u32 2147483648, %v2853_v23  ;;  %vm1021_vm10 = vcmp.eq.f32.partialorder %v2859_v0, inf  ;;  %v1184_v19 = vpop.permute.xlu1 %1183 }
 0x21a   :  { %v994_v44 = vsel %vm993_vm3, %v2779_v11, %v992_v9  ;;  %v2036_v25 = vpop.eup %2035  ;;  %v1006_v52 = vmul.f32 %v2034_v57, %v2814_v37  ;;  %vm1023_vm11 = vcmp.eq.f32.partialorder %v2859_v0, 0.0  ;;  %v1024_v59 = vand.u32 2147483648, %v2859_v0 }
 0x21b   :  { %v997_v6 = vsel %vm995_vm4, %v996_v3, %v994_v44  ;;  %1331 = vrot.lane.b32.xlu1 %v1244_v2, %s2048_s1  ;;  %v1015_v32 = vsel %vm1014_vm5, %v2809_v45, %v1013_v27  ;;  %v1027_v34 = vmul.f32 %v2036_v25, %v2853_v23  ;;  %vm1042_vm12 = vcmp.eq.f32.partialorder %v2881_v36, inf  ;;  %v1182_v44 = vpop.permute.xlu0 %1181 }
 0x21c   :  { %v1243_v4 = vmul.f32 %v1170_v55, %v997_v6  ;;  %v1018_v49 = vsel %vm1016_vm6, %v1017_v60, %v1015_v32  ;;  %v2038_v11 = vpop.eup %2037  ;;  %v1008_v3 = vsel %vm1007_vm7, %v2814_v37, %v1006_v52  ;;  %vm1044_vm13 = vcmp.eq.f32.partialorder %v2881_v36, 0.0 }
 0x21d   :  { %v1246_v28 = vmul.f32 %v1176_v53, %v1018_v49  ;;  %v2040_v13 = vpop.eup %2039  ;;  %v1011_v45 = vsel %vm1009_vm8, %v1010_v10, %v1008_v3  ;;  %v1029_v55 = vsel %vm1028_vm2, %v2853_v23, %v1027_v34  ;;  %v1020_v53 = vmul.f32 %v2038_v11, %v2859_v0  ;;  %v1188_v49 = vpop.permute.xlu1 %1187 }
 0x21e   :  { %1329 = vrot.lane.b32.xlu0 %v1243_v4, %s2048_s1  ;;  %v1245_v48 = vmul.f32 %v1174_v62, %v1011_v45  ;;  %v1032_v47 = vsel %vm1030_vm9, %v1031_v30, %v1029_v55  ;;  %v1041_v9 = vmul.f32 %v2040_v13, %v2881_v36  ;;  %v1045_v27 = vand.u32 2147483648, %v2881_v36 }
 0x21f   :  { %1335 = vrot.lane.b32.xlu1 %v1246_v28, %s2048_s1  ;;  %v2042_v37 = vpop.eup %2041  ;;  %v1248_v60 = vmul.f32 %v1180_v5, %v1032_v47  ;;  %v1022_v2 = vsel %vm1021_vm10, %v2859_v0, %v1020_v53  ;;  %vm1035_vm14 = vcmp.eq.f32.partialorder %v2889_v41, inf  ;;  %vm1037_vm15 = vcmp.eq.f32.partialorder %v2889_v41, 0.0  ;;  %v1186_v13 = vpop.permute.xlu0 %1185 }
 0x220   :  { %v2044_v62 = vpop.eup %2043  ;;  %v1025_v57 = vsel %vm1023_vm11, %v1024_v59, %v1022_v2  ;;  %v1043_v23 = vsel %vm1042_vm12, %v2881_v36, %v1041_v9  ;;  %v1034_v10 = vmul.f32 %v2042_v37, %v2889_v41  ;;  %v1038_v6 = vand.u32 2147483648, %v2889_v41 }
 0x221   :  { %v1247_v5 = vmul.f32 %v1178_v58, %v1025_v57  ;;  %v1046_v25 = vsel %vm1044_vm13, %v1045_v27, %v1043_v23  ;;  %v1055_v32 = vmul.f32 %v2044_v62, %v2915_v15  ;;  %v2046_v52 = vpop.eup %2045  ;;  %vm1056_vm0 = vcmp.eq.f32.partialorder %v2915_v15, inf }
 0x222   :  { %1333 = vrot.lane.b32.xlu0 %v1245_v48, %s2048_s1  ;;  %v1250_v0 = vmul.f32 %v1184_v19, %v1046_v25  ;;  %v1036_v30 = vsel %vm1035_vm14, %v2889_v41, %v1034_v10  ;;  %v1059_v36 = vand.u32 2147483648, %v2915_v15  ;;  %vm1058_vm1 = vcmp.eq.f32.partialorder %v2915_v15, 0.0 }
 0x223   :  { %1339 = vrot.lane.b32.xlu1 %v1248_v60, %s2048_s1  ;;  %v1039_v4 = vsel %vm1037_vm15, %v1038_v6, %v1036_v30  ;;  %v1057_v34 = vsel %vm1056_vm0, %v2915_v15, %v1055_v32  ;;  %v1048_v58 = vmul.f32 %v2046_v52, %v2925_v17  ;;  %vm1049_vm3 = vcmp.eq.f32.partialorder %v2925_v17, inf }
 0x224   :  { %v1060_v11 = vsel %vm1058_vm1, %v1059_v36, %v1057_v34  ;;  %v1052_v28 = vand.u32 2147483648, %v2925_v17  ;;  %v1249_v41 = vmul.f32 %v1182_v44, %v1039_v4  ;;  %vm1051_vm4 = vcmp.eq.f32.partialorder %v2925_v17, 0.0 }
 0x225   :  { %v1050_v3 = vsel %vm1049_vm3, %v2925_v17, %v1048_v58  ;;  %v1252_v59 = vmul.f32 %v1188_v49, %v1060_v11  ;;  %v3390_v49 = vld [vmem:[#allocation16_spill] sm:$0xff]  ;;  %v3391_v11 = vld [vmem:[#allocation18_spill] sm:$0xff]  ;;  %vm1574_vm5 = vcmask 261120   ;;  %vm1607_vm6 = vcmask 392192  }
 0x226   :  { %1337 = vrot.lane.b32.xlu0 %v1247_v5, %s2048_s1  ;;  %v1053_v45 = vsel %vm1051_vm4, %v1052_v28, %v1050_v3 }
 0x227   :  { %1343 = vrot.lane.b32.xlu1 %v1250_v0, %s2048_s1  ;;  %v1251_v15 = vmul.f32 %v1186_v13, %v1053_v45 }
 0x22a   :  { %1341 = vrot.lane.b32.xlu0 %v1249_v41, %s2048_s1 }
 0x22b   :  { %1347 = vrot.lane.b32.xlu1 %v1252_v59, %s2048_s1 }
 0x22e   :  { %1345 = vrot.lane.b32.xlu0 %v1251_v15, %s2048_s1 }
 0x24d   :  { %v1286_v55 = vpop.permute.xlu0 %1285 }
 0x24e   :  { %v1381_v53 = vadd.f32 %v1286_v55, %v2400_v16 }
 0x250   :  { %1445 = vrot.lane.b32.xlu0 %v1381_v53, %s2049_s22  ;;  %v3393_v53 = vld [vmem:[#allocation25_spill] sm:$0xff] }
 0x251   :  { %v1290_v19 = vpop.permute.xlu0 %1289 }
 0x252   :  { %v1383_v17 = vadd.f32 %v1290_v19, %v2406_v20 }
 0x254   :  { %1449 = vrot.lane.b32.xlu0 %v1383_v17, %s2049_s22 }
 0x255   :  { %v1288_v48 = vpop.permute.xlu1 %1287 }
 0x256   :  { %v1382_v47 = vadd.f32 %v2397_v14, %v1288_v48  ;;  %v3394_v48 = vld [vmem:[#allocation26_spill] sm:$0xff] }
 0x258   :  { %1447 = vrot.lane.b32.xlu1 %v1382_v47, %s2049_s22 }
 0x259   :  { %v1292_v9 = vpop.permute.xlu1 %1291 }
 0x25a   :  { %v1384_v37 = vadd.f32 %v2403_v18, %v1292_v9  ;;  %v1294_v60 = vpop.permute.xlu0 %1293  ;;  %v3395_v9 = vld [vmem:[#allocation28_spill] sm:$0xff] }
 0x25b   :  { %v1385_v2 = vadd.f32 %v1294_v60, %v2412_v24 }
 0x25c   :  { %1451 = vrot.lane.b32.xlu1 %v1384_v37, %s2049_s22 }
 0x25d   :  { %v1296_v16 = vpop.permute.xlu1 %1295  ;;  %1453 = vrot.lane.b32.xlu0 %v1385_v2, %s2049_s22 }
 0x25e   :  { %v1386_v20 = vadd.f32 %v2409_v22, %v1296_v16 }
 0x25f   :  { %v1298_v27 = vpop.permute.xlu0 %1297 }
 0x260   :  { %1455 = vrot.lane.b32.xlu1 %v1386_v20, %s2049_s22  ;;  %v1387_v14 = vadd.f32 %v1298_v27, %v2418_v29  ;;  %v3396_v20 = vld [vmem:[#allocation3_spill] sm:$0xff] }
 0x261   :  { %v1300_v62 = vpop.permute.xlu1 %1299 }
 0x262   :  { %v1388_v57 = vadd.f32 %v2415_v26, %v1300_v62  ;;  %1457 = vrot.lane.b32.xlu0 %v1387_v14, %s2049_s22  ;;  %v3397_v14 = vld [vmem:[#allocation5_spill] sm:$0xff] }
 0x264   :  { %1459 = vrot.lane.b32.xlu1 %v1388_v57, %s2049_s22  ;;  %v3398_v57 = vld [vmem:[#allocation2_spill] sm:$0xff] }
 0x265   :  { %v1304_v18 = vpop.permute.xlu1 %1303 }
 0x266   :  { %v1390_v24 = vadd.f32 %v2430_v35, %v1304_v18  ;;  %v1302_v23 = vpop.permute.xlu0 %1301 }
 0x267   :  { %v1389_v44 = vadd.f32 %v1302_v23, %v2438_v39  ;;  %v3399_v23 = vld [vmem:[#allocation4_spill] sm:$0xff] }
 0x268   :  { %1463 = vrot.lane.b32.xlu1 %v1390_v24, %s2049_s22 }
 0x269   :  { %1461 = vrot.lane.b32.xlu0 %v1389_v44, %s2049_s22 }
 0x271   :  { %v1308_v22 = vpop.permute.xlu1 %1307 }
 0x272   :  { %v1392_v29 = vadd.f32 %v2453_v46, %v1308_v22 }
 0x274   :  { %v1306_v10 = vpop.permute.xlu0 %1305  ;;  %1467 = vrot.lane.b32.xlu1 %v1392_v29, %s2049_s22  ;;  %v3400_v29 = vld [vmem:[#allocation7_spill] sm:$0xff] }
 0x275   :  { %v1391_v26 = vadd.f32 %v1306_v10, %v2461_v50  ;;  %v1312_v5 = vpop.permute.xlu1 %1311 }
 0x276   :  { %v1394_v25 = vadd.f32 %v2474_v56, %v1312_v5  ;;  %v3401_v5 = vld [vmem:[#allocation6_spill] sm:$0xff] }
 0x277   :  { %1465 = vrot.lane.b32.xlu0 %v1391_v26, %s2049_s22 }
 0x278   :  { %1471 = vrot.lane.b32.xlu1 %v1394_v25, %s2049_s22  ;;  %v1310_v35 = vpop.permute.xlu0 %1309 }
 0x279   :  { %v1393_v39 = vadd.f32 %v1310_v35, %v2483_v61 }
 0x27b   :  { %v1316_v6 = vpop.permute.xlu1 %1315  ;;  %1469 = vrot.lane.b32.xlu0 %v1393_v39, %s2049_s22  ;;  %v3402_v39 = vld [vmem:[#allocation9_spill] sm:$0xff] }
 0x27c   :  { %v1396_v46 = vadd.f32 %v2504_v8, %v1316_v6  ;;  %v1314_v32 = vpop.permute.xlu0 %1313 }
 0x27d   :  { %v1395_v52 = vadd.f32 %v1314_v32, %v2513_v12  ;;  %v3403_v32 = vld [vmem:[#allocation8_spill] sm:$0xff] }
 0x27e   :  { %1475 = vrot.lane.b32.xlu1 %v1396_v46, %s2049_s22 }
 0x27f   :  { %v1320_v50 = vpop.permute.xlu1 %1319  ;;  %1473 = vrot.lane.b32.xlu0 %v1395_v52, %s2049_s22 }
 0x280   :  { %v1398_v56 = vadd.f32 %v2543_v42, %v1320_v50  ;;  %v1318_v0 = vpop.permute.xlu0 %1317 }
 0x281   :  { %v1397_v30 = vadd.f32 %v1318_v0, %v2551_v51 }
 0x282   :  { %1479 = vrot.lane.b32.xlu1 %v1398_v56, %s2049_s22  ;;  %v3404_v56 = vld [vmem:[#allocation10_spill] sm:$0xff] }
 0x283   :  { %v1324_v61 = vpop.permute.xlu1 %1323  ;;  %1477 = vrot.lane.b32.xlu0 %v1397_v30, %s2049_s22 }
 0x284   :  { %v1400_v8 = vadd.f32 %v2581_v43, %v1324_v61  ;;  %v3405_v61 = vld [vmem:[#allocation11_spill] sm:$0xff] }
 0x285   :  { %v1322_v36 = vpop.permute.xlu0 %1321 }
 0x286   :  { %v1399_v12 = vadd.f32 %v1322_v36, %v2590_v40  ;;  %1483 = vrot.lane.b32.xlu1 %v1400_v8, %s2049_s22  ;;  %v3392_v40 = vld [vmem:[#allocation20_spill] sm:$0xff] }
 0x287   :  { %v1328_v4 = vpop.permute.xlu1 %1327 }
 0x288   :  { %1481 = vrot.lane.b32.xlu0 %v1399_v12, %s2049_s22  ;;  %v1402_v42 = vadd.f32 %v2621_v31, %v1328_v4  ;;  %v3406_v12 = vld [vmem:[#allocation12_spill] sm:$0xff] }
 0x289   :  { %v1326_v51 = vpop.permute.xlu0 %1325 }
 0x28a   :  { %1487 = vrot.lane.b32.xlu1 %v1402_v42, %s2049_s22  ;;  %v1401_v34 = vadd.f32 %v1326_v51, %v3390_v49  ;;  %v3407_v51 = vld [vmem:[#allocation13_spill] sm:$0xff] }
 0x28c   :  { %1485 = vrot.lane.b32.xlu0 %v1401_v34, %s2049_s22 }
 0x28d   :  { %v1332_v58 = vpop.permute.xlu1 %1331 }
 0x28e   :  { %v1404_v28 = vadd.f32 %v3391_v11, %v1332_v58  ;;  %v3408_v58 = vld [vmem:[#allocation14_spill] sm:$0xff] }
 0x290   :  { %v1330_v43 = vpop.permute.xlu0 %1329  ;;  %1491 = vrot.lane.b32.xlu1 %v1404_v28, %s2049_s22 }
 0x291   :  { %v1403_v41 = vadd.f32 %v1330_v43, %v3392_v40  ;;  %v1336_v3 = vpop.permute.xlu1 %1335  ;;  %v3409_v43 = vld [vmem:[#allocation15_spill] sm:$0xff] }
 0x292   :  { %v1406_v59 = vadd.f32 %v2696_v21, %v1336_v3  ;;  %v3410_v3 = vld [vmem:[#allocation17_spill] sm:$0xff] }
 0x293   :  { %1489 = vrot.lane.b32.xlu0 %v1403_v41, %s2049_s22 }
 0x294   :  { %v1334_v31 = vpop.permute.xlu0 %1333  ;;  %1495 = vrot.lane.b32.xlu1 %v1406_v59, %s2049_s22 }
 0x295   :  { %v1405_v13 = vadd.f32 %v1334_v31, %v2707_v54  ;;  %v1340_v45 = vpop.permute.xlu1 %1339 }
 0x296   :  { %v1408_v15 = vadd.f32 %v2732_v38, %v1340_v45 }
 0x297   :  { %1493 = vrot.lane.b32.xlu0 %v1405_v13, %s2049_s22  ;;  %v3411_v13 = vld [vmem:[#allocation19_spill] sm:$0xff] }
 0x298   :  { %v1338_v55 = vpop.permute.xlu0 %1337  ;;  %1499 = vrot.lane.b32.xlu1 %v1408_v15, %s2049_s22 }
 0x299   :  { %v1407_v19 = vadd.f32 %v1338_v55, %v3393_v53  ;;  %v1344_v17 = vpop.permute.xlu1 %1343  ;;  %v3412_v55 = vld [vmem:[#allocation21_spill] sm:$0xff] }
 0x29a   :  { %v1410_v21 = vadd.f32 %v3394_v48, %v1344_v17  ;;  %v3413_v17 = vld [vmem:[#allocation22_spill] sm:$0xff] }
 0x29b   :  { %1497 = vrot.lane.b32.xlu0 %v1407_v19, %s2049_s22 }
 0x29c   :  { %v1342_v47 = vpop.permute.xlu0 %1341  ;;  %1503 = vrot.lane.b32.xlu1 %v1410_v21, %s2049_s22 }
 0x29d   :  { %v1409_v54 = vadd.f32 %v1342_v47, %v3395_v9  ;;  %v1348_v37 = vpop.permute.xlu1 %1347  ;;  %v3414_v47 = vld [vmem:[#allocation23_spill] sm:$0xff] }
 0x29e   :  { %v1412_v38 = vadd.f32 %v2781_v33, %v1348_v37  ;;  %v3415_v37 = vld [vmem:[#allocation24_spill] sm:$0xff] }
 0x29f   :  { %1501 = vrot.lane.b32.xlu0 %v1409_v54, %s2049_s22 }
 0x2a0   :  { %v1346_v60 = vpop.permute.xlu0 %1345  ;;  %1507 = vrot.lane.b32.xlu1 %v1412_v38, %s2049_s22 }
 0x2a1   :  { %v1411_v2 = vadd.f32 %v1346_v60, %v2791_v1 }
 0x2a3   :  { %1505 = vrot.lane.b32.xlu0 %v1411_v2, %s2049_s22  ;;  %v3416_v2 = vld [vmem:[#allocation27_spill] sm:$0xff] }
 0x2c2   :  { %v1446_v16 = vpop.permute.xlu0 %1445 }
 0x2c3   :  { %v1575_v27 = vsel %vm1574_vm5, %v3396_v20, %v1446_v16 }
 0x2c4   :  { %1608 = vst.msk [vmem:[%s3345_s4] sm:$0xff] %vm1607_vm6, %v1575_v27  ;;  %v3417_v27 = vld [vmem:[#allocation29_spill] sm:$0xff] }
 0x2c6   :  { %v1450_v33 = vpop.permute.xlu0 %1449 }
 0x2c7   :  { %v1577_v62 = vsel %vm1574_vm5, %v3397_v14, %v1450_v33 }
 0x2c8   :  { %1610 = vst.msk [vmem:[%s3345_s4 + $0x10] sm:$0xff] %vm1607_vm6, %v1577_v62  ;;  %v3418_v62 = vld [vmem:[#allocation30_spill] sm:$0xff] }
 0x2ca   :  { %v1448_v1 = vpop.permute.xlu1 %1447 }
 0x2cb   :  { %v1576_v18 = vsel %vm1574_vm5, %v3398_v57, %v1448_v1 }
 0x2cc   :  { %1609 = vst.msk [vmem:[%s3345_s4 + $0x8] sm:$0xff] %vm1607_vm6, %v1576_v18  ;;  %v3419_v18 = vld [vmem:[#allocation31_spill] sm:$0xff] }
 0x2ce   :  { %v1452_v24 = vpop.permute.xlu1 %1451 }
 0x2cf   :  { %v1578_v44 = vsel %vm1574_vm5, %v3399_v23, %v1452_v24  ;;  %v1454_v22 = vpop.permute.xlu0 %1453 }
 0x2d0   :  { %1611 = vst.msk [vmem:[%s3345_s4 + $0x18] sm:$0xff] %vm1607_vm6, %v1578_v44  ;;  %v1579_v10 = vsel %vm1574_vm5, %v3400_v29, %v1454_v22  ;;  %v3420_v44 = vld [vmem:[#allocation32_spill] sm:$0xff] }
 0x2d1   :  { %1612 = vst.msk [vmem:[%s3345_s4 + $0x20] sm:$0xff] %vm1607_vm6, %v1579_v10  ;;  %v3421_v10 = vld [vmem:[#allocation33_spill] sm:$0xff] }
 0x2d2   :  { %v1456_v26 = vpop.permute.xlu1 %1455 }
 0x2d3   :  { %v1580_v25 = vsel %vm1574_vm5, %v3401_v5, %v1456_v26 }
 0x2d4   :  { %1613 = vst.msk [vmem:[%s3345_s4 + $0x28] sm:$0xff] %vm1607_vm6, %v1580_v25  ;;  %v1458_v35 = vpop.permute.xlu0 %1457  ;;  %v3422_v25 = vld [vmem:[#allocation34_spill] sm:$0xff] }
 0x2d5   :  { %v1581_v6 = vsel %vm1574_vm5, %v3402_v39, %v1458_v35 }
 0x2d6   :  { %v1460_v46 = vpop.permute.xlu1 %1459  ;;  %1614 = vst.msk [vmem:[%s3345_s4 + $0x30] sm:$0xff] %vm1607_vm6, %v1581_v6  ;;  %v3423_v6 = vld [vmem:[#allocation35_spill] sm:$0xff] }
 0x2d7   :  { %v1582_v52 = vsel %vm1574_vm5, %v3403_v32, %v1460_v46 }
 0x2d8   :  { %1615 = vst.msk [vmem:[%s3345_s4 + $0x38] sm:$0xff] %vm1607_vm6, %v1582_v52  ;;  %v3424_v52 = vld [vmem:[#allocation36_spill] sm:$0xff] }
 0x2da   :  { %v1464_v50 = vpop.permute.xlu1 %1463 }
 0x2db   :  { %v1584_v0 = vsel %vm1574_vm5, %v3404_v56, %v1464_v50  ;;  %v1462_v30 = vpop.permute.xlu0 %1461 }
 0x2dc   :  { %1617 = vst.msk [vmem:[%s3345_s4 + $0x48] sm:$0xff] %vm1607_vm6, %v1584_v0  ;;  %v1583_v8 = vsel %vm1574_vm5, %v3405_v61, %v1462_v30  ;;  %v3425_v0 = vld [vmem:[#allocation37_spill] sm:$0xff] }
 0x2dd   :  { %1616 = vst.msk [vmem:[%s3345_s4 + $0x40] sm:$0xff] %vm1607_vm6, %v1583_v8 }
 0x2e6   :  { %v1468_v36 = vpop.permute.xlu1 %1467 }
 0x2e7   :  { %v1586_v4 = vsel %vm1574_vm5, %v3406_v12, %v1468_v36 }
 0x2e8   :  { %1619 = vst.msk [vmem:[%s3345_s4 + $0x58] sm:$0xff] %vm1607_vm6, %v1586_v4 }
 0x2e9   :  { %v1466_v42 = vpop.permute.xlu0 %1465 }
 0x2ea   :  { %v1585_v49 = vsel %vm1574_vm5, %v3407_v51, %v1466_v42  ;;  %v1472_v34 = vpop.permute.xlu1 %1471 }
 0x2eb   :  { %1618 = vst.msk [vmem:[%s3345_s4 + $0x50] sm:$0xff] %vm1607_vm6, %v1585_v49  ;;  %v1588_v11 = vsel %vm1574_vm5, %v3408_v58, %v1472_v34 }
 0x2ec   :  { %1621 = vst.msk [vmem:[%s3345_s4 + $0x68] sm:$0xff] %vm1607_vm6, %v1588_v11 }
 0x2ed   :  { %v1470_v28 = vpop.permute.xlu0 %1469 }
 0x2ee   :  { %v1587_v40 = vsel %vm1574_vm5, %v3409_v43, %v1470_v28 }
 0x2ef   :  { %1620 = vst.msk [vmem:[%s3345_s4 + $0x60] sm:$0xff] %vm1607_vm6, %v1587_v40 }
 0x2f0   :  { %v1476_v41 = vpop.permute.xlu1 %1475 }
 0x2f1   :  { %v1590_v59 = vsel %vm1574_vm5, %v3410_v3, %v1476_v41  ;;  %v1474_v31 = vpop.permute.xlu0 %1473 }
 0x2f2   :  { %1623 = vst.msk [vmem:[%s3345_s4 + $0x78] sm:$0xff] %vm1607_vm6, %v1590_v59  ;;  %v1589_v45 = vsel %vm1574_vm5, %v3411_v13, %v1474_v31 }
 0x2f3   :  { %1622 = vst.msk [vmem:[%s3345_s4 + $0x70] sm:$0xff] %vm1607_vm6, %v1589_v45 }
 0x2f4   :  { %v1480_v15 = vpop.permute.xlu1 %1479 }
 0x2f5   :  { %v1592_v53 = vsel %vm1574_vm5, %v3412_v55, %v1480_v15  ;;  %v1478_v19 = vpop.permute.xlu0 %1477 }
 0x2f6   :  { %1625 = vst.msk [vmem:[%s3345_s4 + $0x88] sm:$0xff] %vm1607_vm6, %v1592_v53  ;;  %v1591_v48 = vsel %vm1574_vm5, %v3413_v17, %v1478_v19 }
 0x2f7   :  { %1624 = vst.msk [vmem:[%s3345_s4 + $0x80] sm:$0xff] %vm1607_vm6, %v1591_v48 }
 0x2f8   :  { %v1484_v21 = vpop.permute.xlu1 %1483 }
 0x2f9   :  { %v1594_v9 = vsel %vm1574_vm5, %v3414_v47, %v1484_v21 }
 0x2fa   :  { %v1482_v54 = vpop.permute.xlu0 %1481  ;;  %1627 = vst.msk [vmem:[%s3345_s4 + $0x98] sm:$0xff] %vm1607_vm6, %v1594_v9 }
 0x2fb   :  { %v1593_v38 = vsel %vm1574_vm5, %v3415_v37, %v1482_v54 }
 0x2fc   :  { %1626 = vst.msk [vmem:[%s3345_s4 + $0x90] sm:$0xff] %vm1607_vm6, %v1593_v38  ;;  %v1488_v60 = vpop.permute.xlu1 %1487 }
 0x2fd   :  { %v1596_v16 = vsel %vm1574_vm5, %v3416_v2, %v1488_v60 }
 0x2fe   :  { %1629 = vst.msk [vmem:[%s3345_s4 + $0xa8] sm:$0xff] %vm1607_vm6, %v1596_v16  ;;  %v1486_v20 = vpop.permute.xlu0 %1485 }
 0x2ff   :  { %v1595_v33 = vsel %vm1574_vm5, %v3417_v27, %v1486_v20 }
 0x300   :  { %1628 = vst.msk [vmem:[%s3345_s4 + $0xa0] sm:$0xff] %vm1607_vm6, %v1595_v33 }
 0x302   :  { %v1492_v14 = vpop.permute.xlu1 %1491 }
 0x303   :  { %v1598_v1 = vsel %vm1574_vm5, %v3418_v62, %v1492_v14 }
 0x304   :  { %1631 = vst.msk [vmem:[%s3345_s4 + $0xb8] sm:$0xff] %vm1607_vm6, %v1598_v1 }
 0x305   :  { %v1490_v57 = vpop.permute.xlu0 %1489 }
 0x306   :  { %v1597_v24 = vsel %vm1574_vm5, %v3419_v18, %v1490_v57  ;;  %v1496_v23 = vpop.permute.xlu1 %1495 }
 0x307   :  { %1630 = vst.msk [vmem:[%s3345_s4 + $0xb0] sm:$0xff] %vm1607_vm6, %v1597_v24  ;;  %v1600_v22 = vsel %vm1574_vm5, %v3420_v44, %v1496_v23 }
 0x308   :  { %1633 = vst.msk [vmem:[%s3345_s4 + $0xc8] sm:$0xff] %vm1607_vm6, %v1600_v22 }
 0x309   :  { %v1494_v29 = vpop.permute.xlu0 %1493 }
 0x30a   :  { %v1599_v26 = vsel %vm1574_vm5, %v3421_v10, %v1494_v29  ;;  %v1500_v5 = vpop.permute.xlu1 %1499 }
 0x30b   :  { %1632 = vst.msk [vmem:[%s3345_s4 + $0xc0] sm:$0xff] %vm1607_vm6, %v1599_v26  ;;  %v1602_v35 = vsel %vm1574_vm5, %v3422_v25, %v1500_v5 }
 0x30c   :  { %1635 = vst.msk [vmem:[%s3345_s4 + $0xd8] sm:$0xff] %vm1607_vm6, %v1602_v35 }
 0x30d   :  { %v1498_v39 = vpop.permute.xlu0 %1497 }
 0x30e   :  { %v1601_v46 = vsel %vm1574_vm5, %v3423_v6, %v1498_v39  ;;  %v1504_v32 = vpop.permute.xlu1 %1503 }
 0x30f   :  { %1634 = vst.msk [vmem:[%s3345_s4 + $0xd0] sm:$0xff] %vm1607_vm6, %v1601_v46  ;;  %v1604_v50 = vsel %vm1574_vm5, %v3424_v52, %v1504_v32 }
 0x310   :  { %1637 = vst.msk [vmem:[%s3345_s4 + $0xe8] sm:$0xff] %vm1607_vm6, %v1604_v50 }
 0x311   :  { %v1502_v56 = vpop.permute.xlu0 %1501 }
 0x312   :  { %v1603_v30 = vsel %vm1574_vm5, %v3425_v0, %v1502_v56  ;;  %v1508_v61 = vpop.permute.xlu1 %1507 }
 0x313   :  { %1636 = vst.msk [vmem:[%s3345_s4 + $0xe0] sm:$0xff] %vm1607_vm6, %v1603_v30  ;;  %v1606_v8 = vsel %vm1574_vm5, %v2934_v63, %v1508_v61 }
 0x314   :  { %1639 = vst.msk [vmem:[%s3345_s4 + $0xf8] sm:$0xff] %vm1607_vm6, %v1606_v8 }
 0x315   :  { %v1506_v36 = vpop.permute.xlu0 %1505 }
 0x316   :  { %v1605_v12 = vsel %vm1574_vm5, %v2941_v7, %v1506_v36 }
 0x317   :  { %1638 = vst.msk [vmem:[%s3345_s4 + $0xf0] sm:$0xff] %vm1607_vm6, %v1605_v12 }

</bundles_post_ra>
